<compile_context>
chip_gen: v7x
topology: tpu7x:2x2x1
jax: 0.10.0
libtpu: 0.0.40
codegen_flags: <defaults>
</compile_context>

<pallas_src>
import numpy as np
import jax
import jax.numpy as jnp
from jax.experimental import pallas as pl
from jax.experimental.pallas import tpu as pltpu

LEAKY_SLOPE = 0.01   # torch.nn.LeakyReLU default
BN_EPS = 1e-5        # torch.nn.BatchNorm2d default


def _conv2x_kernel(x_ref, rem_ref, sel_ref, w1_ref, b1_ref, w2_ref, b2_ref,
                   o_ref, fb_ref, ybuf_ref, rbuf_ref):
    f32 = jnp.float32
    cin, hh, ww = x_ref.shape          # (Cin, H, W) of one image
    ho, wo = hh // 2, ww // 2          # conv1 output spatial size
    ph = wo + 1                        # per-phase padded row width = (W+2)/2
    rs = 2 * ph                        # interleaved phase-buffer row stride
    rstride1 = 2 * rs                  # conv1 over-width output row stride
    alen1 = ho * rstride1              # conv1 over-width output length
    sout = ho * wo                     # conv2 / final spatial size

    # Zero the scratch buffers: their zero regions *are* the conv zero padding.
    fb_ref[...] = jnp.zeros(fb_ref.shape, f32)
    ybuf_ref[...] = jnp.zeros(ybuf_ref.shape, f32)
    rbuf_ref[...] = jnp.zeros(rbuf_ref.shape, f32)

    # ---- stage 1: stride-2 column de-interleave + horizontal zero-pad, done with
    # one tiny 0/1 selection matmul (only leading dims are reshaped; the lane axis
    # is never split in-kernel).
    #   fb[c, r*rs + j]      = xpad[c, r, 2j]       (even padded columns)
    #   fb[c, r*rs + ph + j] = xpad[c, r, 2j + 1]   (odd  padded columns)
    xm = x_ref[...].reshape(cin * hh, ww)
    phases = jnp.dot(xm, sel_ref[...], preferred_element_type=f32)
    phases = phases.reshape(cin, hh, rs)
    for r in range(hh):                               # padded rows 1 .. H
        fb_ref[:, (r + 1) * rs:(r + 2) * rs] = phases[:, r, :]

    # ---- stage 2: conv1 (3x3, stride 2, pad 1) as ONE fused weight-stationary
    # matmul; every tap of the strided conv is a contiguous lane slice of fb.
    offs1 = [kh * rs + (0, ph, 1)[kw] for kh in range(3) for kw in range(3)]
    patch1 = jnp.concatenate([fb_ref[:, o:o + alen1] for o in offs1], axis=0)
    acc1 = jnp.dot(w1_ref[...], patch1, preferred_element_type=f32)   # (C1, alen1)
    acc1 = acc1 + b1_ref[...]                                         # folded BN1 bias
    y1 = jnp.maximum(acc1, LEAKY_SLOPE * acc1)                        # LeakyReLU

    # ---- stage 3: scatter y1 / rem into conv2's vertically-padded flat buffers
    # (the channel concat never hits HBM or VMEM as a real tensor).
    for h in range(ho):
        ybuf_ref[:, 1 + (h + 1) * wo:1 + (h + 2) * wo] = y1[:, h * rstride1:h * rstride1 + wo]
    rbuf_ref[:, 1 + wo:1 + wo + sout] = rem_ref[...]

    # ---- stage 4: conv2 (3x3, stride 1, pad 1) as ONE fused matmul over both
    # channel halves. Horizontal padding is emulated by masking the two taps that
    # would wrap around a row edge.
    col = jax.lax.broadcasted_iota(jnp.int32, (1, sout), 1) % wo
    mask_l = (col != 0).astype(f32)        # kills wrapped reads for kw == 0
    mask_r = (col != wo - 1).astype(f32)   # kills wrapped reads for kw == 2

    def tap_slabs(buf):
        slabs = []
        for kh in range(3):
            for kw in range(3):
                sl = buf[:, kh * wo + kw:kh * wo + kw + sout]
                if kw == 0:
                    sl = sl * mask_l
                elif kw == 2:
                    sl = sl * mask_r
                slabs.append(sl)
        return slabs

    patch2 = jnp.concatenate(tap_slabs(ybuf_ref) + tap_slabs(rbuf_ref), axis=0)
    acc2 = jnp.dot(w2_ref[...], patch2, preferred_element_type=f32)   # (C2, sout)
    acc2 = acc2 + b2_ref[...]                                         # folded BN2 bias
    o_ref[...] = jnp.maximum(acc2, LEAKY_SLOPE * acc2)


def conv2x_forward(x, rem, w1, bn1, w2, bn2):
    """Pallas TPU forward of Conv2x (2-D, deconv=False, concat=True, keep_concat=True).

    x   : (N, Cin, H, W) f32          rem : (N, C1, H/2, W/2) f32
    w1  : (C1, Cin, 3, 3)             w2  : (C2, 2*C1, 3, 3) with C2 = 2*C1
    bn1 / bn2 : (gamma, beta, running_mean, running_var)
    returns (N, C2, H/2, W/2) f32, NCHW.
    """
    N, cin, H, W = x.shape
    c1 = w1.shape[0]
    c2 = w2.shape[0]
    assert H % 2 == 0 and W % 2 == 0
    assert w1.shape == (c1, cin, 3, 3) and w2.shape == (c2, 2 * c1, 3, 3)
    ho, wo = H // 2, W // 2
    assert rem.shape == (N, c1, ho, wo)

    # TODO(synk): BatchNorm is applied with inference (running) statistics folded
    # into the conv weights; torch training-mode batch statistics would need an
    # extra cross-image reduction pass.
    g1, be1, m1, v1 = bn1
    g2, be2, m2, v2 = bn2
    s1 = g1 / jnp.sqrt(v1 + BN_EPS)
    b1 = (be1 - m1 * s1).reshape(c1, 1).astype(jnp.float32)
    w1mat = jnp.transpose(w1 * s1[:, None, None, None], (0, 2, 3, 1)
                          ).reshape(c1, 9 * cin).astype(jnp.float32)
    s2 = g2 / jnp.sqrt(v2 + BN_EPS)
    b2 = (be2 - m2 * s2).reshape(c2, 1).astype(jnp.float32)
    w2f = w2 * s2[:, None, None, None]
    w2mat = jnp.concatenate(                        # (C2, 18*C1): [y1-half | rem-half]
        [jnp.transpose(w2f[:, :c1], (0, 2, 3, 1)).reshape(c2, 9 * c1),
         jnp.transpose(w2f[:, c1:], (0, 2, 3, 1)).reshape(c2, 9 * c1)],
        axis=1).astype(jnp.float32)

    # 0/1 matrix that de-interleaves one row of x into (even | odd) padded columns
    # of the stride-2 phase buffer (also realizes the horizontal zero padding).
    ph = wo + 1
    rs = 2 * ph
    sel = np.zeros((W, rs), np.float32)
    for j in range(ph):
        if 0 <= 2 * j - 1 < W:
            sel[2 * j - 1, j] = 1.0        # padded even column 2j   = x column 2j-1
        if 2 * j < W:
            sel[2 * j, ph + j] = 1.0       # padded odd  column 2j+1 = x column 2j
    sel = jnp.asarray(sel)

    sout = ho * wo
    fbn = (H + 3) * rs                     # phase buffer length (incl. read guard)
    cbn = (ho + 4) * wo                    # conv2 flat buffer length (incl. guard)
    rem_flat = rem.reshape(N, c1, sout)    # trailing-dim merge: free in XLA

    out_flat = pl.pallas_call(
        _conv2x_kernel,
        out_shape=jax.ShapeDtypeStruct((N, c2, sout), jnp.float32),
        grid_spec=pltpu.PrefetchScalarGridSpec(
            num_scalar_prefetch=0,
            grid=(N,),
            in_specs=[
                pl.BlockSpec((None, cin, H, W), lambda n: (n, 0, 0, 0)),
                pl.BlockSpec((None, c1, sout), lambda n: (n, 0, 0)),
                pl.BlockSpec((W, rs), lambda n: (0, 0)),
                pl.BlockSpec((c1, 9 * cin), lambda n: (0, 0)),
                pl.BlockSpec((c1, 1), lambda n: (0, 0)),
                pl.BlockSpec((c2, 18 * c1), lambda n: (0, 0)),
                pl.BlockSpec((c2, 1), lambda n: (0, 0)),
            ],
            out_specs=pl.BlockSpec((None, c2, sout), lambda n: (n, 0, 0)),
            scratch_shapes=[
                pltpu.VMEM((cin, fbn), jnp.float32),   # padded, phase-split input
                pltpu.VMEM((c1, cbn), jnp.float32),    # padded y1 (conv1 output)
                pltpu.VMEM((c1, cbn), jnp.float32),    # padded rem
            ],
        ),
        compiler_params=pltpu.CompilerParams(
            dimension_semantics=("parallel",),         # v7x: one image per TensorCore
            vmem_limit_bytes=32 * 1024 * 1024,
        ),
    )(x, rem_flat, sel, w1mat, b1, w2mat, b2)

    # (N, C2, Ho*Wo) -> (N, C2, Ho, Wo): trailing-dim split, free in XLA (already NCHW).
    return out_flat.reshape(N, c2, ho, wo)


if __name__ == "__main__":
    # Conv2x(in_channels=4, out_channels=8): conv1 = Conv2d(4->8, k3, s2, p1, bias=False),
    # conv2 = Conv2d(16->16, k3, s1, p1, bias=False); BN + LeakyReLU after each conv.
    N, cin, H, W = 2, 4, 16, 16
    c1, c2 = 8, 16
    ho, wo = H // 2, W // 2

    key = jax.random.PRNGKey(0)
    (kx, kr, k1, k2,
     kg1, kb1, km1, kv1,
     kg2, kb2, km2, kv2) = jax.random.split(key, 12)

    x = jax.random.normal(kx, (N, cin, H, W), dtype=jnp.float32)
    rem = jax.random.normal(kr, (N, c1, ho, wo), dtype=jnp.float32)

    bnd1 = 1.0 / np.sqrt(cin * 9)
    w1 = jax.random.uniform(k1, (c1, cin, 3, 3), minval=-bnd1, maxval=bnd1,
                            dtype=jnp.float32)
    bnd2 = 1.0 / np.sqrt(2 * c1 * 9)
    w2 = jax.random.uniform(k2, (c2, 2 * c1, 3, 3), minval=-bnd2, maxval=bnd2,
                            dtype=jnp.float32)

    bn1 = (jax.random.uniform(kg1, (c1,), minval=0.5, maxval=1.5),
           0.1 * jax.random.normal(kb1, (c1,)),
           0.1 * jax.random.normal(km1, (c1,)),
           jax.random.uniform(kv1, (c1,), minval=0.5, maxval=1.5))
    bn2 = (jax.random.uniform(kg2, (c2,), minval=0.5, maxval=1.5),
           0.1 * jax.random.normal(kb2, (c2,)),
           0.1 * jax.random.normal(km2, (c2,)),
           jax.random.uniform(kv2, (c2,), minval=0.5, maxval=1.5))

    out = conv2x_forward(x, rem, w1, bn1, w2, bn2)
    out = jax.block_until_ready(out)
    assert out.shape == (N, c2, ho, wo)

    # Pure-JAX reference: conv -> BN(eval) -> LeakyReLU, concat, conv -> BN -> LeakyReLU.
    def ref_forward(x, rem, w1, bn1, w2, bn2):
        def block(z, w, bn, stride):
            y = jax.lax.conv_general_dilated(
                z, w, window_strides=(stride, stride), padding=((1, 1), (1, 1)),
                dimension_numbers=("NCHW", "OIHW", "NCHW"),
                precision=jax.lax.Precision.HIGHEST)
            g, b, m, v = bn
            scale = (g / jnp.sqrt(v + BN_EPS))[None, :, None, None]
            y = (y - m[None, :, None, None]) * scale + b[None, :, None, None]
            return jnp.where(y >= 0, y, LEAKY_SLOPE * y)
        y1 = block(x, w1, bn1, 2)
        return block(jnp.concatenate([y1, rem], axis=1), w2, bn2, 1)

    ref = ref_forward(x, rem, w1, bn1, w2, bn2)
    err = jnp.max(jnp.abs(out - ref))
    assert jnp.allclose(out, ref, atol=5e-3, rtol=5e-3), f"max abs err {err}"
    print("KERNEL_OK")
</pallas_src>

<mosaic_0001>
module attributes {stable_mosaic.version = 11 : i64} {
  func.func @_conv2x_kernel(%arg0: i32, %arg1: memref<1x4x16x16xf32, #tpu.memory_space<vmem>>, %arg2: memref<1x8x64xf32, #tpu.memory_space<vmem>>, %arg3: memref<16x18xf32, #tpu.memory_space<vmem>>, %arg4: memref<8x36xf32, #tpu.memory_space<vmem>>, %arg5: memref<8x1xf32, #tpu.memory_space<vmem>>, %arg6: memref<16x144xf32, #tpu.memory_space<vmem>>, %arg7: memref<16x1xf32, #tpu.memory_space<vmem>>, %arg8: memref<1x16x64xf32, #tpu.memory_space<vmem>>, %arg9: memref<4x342xf32, #tpu.memory_space<vmem>>, %arg10: memref<8x96xf32, #tpu.memory_space<vmem>>, %arg11: memref<8x96xf32, #tpu.memory_space<vmem>>) attributes {dimension_semantics = [#tpu.dimension_semantics<parallel>], iteration_bounds = array<i64: 2>, scalar_prefetch = 0 : i64, scratch_operands = 3 : i64, tpu.core_type = #tpu.core_type<tc>, window_params = [{transform_indices = @transform_0, window_bounds = array<i64: 1, 4, 16, 16>}, {transform_indices = @transform_1, window_bounds = array<i64: 1, 8, 64>}, {pipeline_mode = #tpu.pipeline_mode<synchronous>, transform_indices = @transform_2, window_bounds = array<i64: 16, 18>}, {pipeline_mode = #tpu.pipeline_mode<synchronous>, transform_indices = @transform_3, window_bounds = array<i64: 8, 36>}, {pipeline_mode = #tpu.pipeline_mode<synchronous>, transform_indices = @transform_4, window_bounds = array<i64: 8, 1>}, {pipeline_mode = #tpu.pipeline_mode<synchronous>, transform_indices = @transform_5, window_bounds = array<i64: 16, 144>}, {pipeline_mode = #tpu.pipeline_mode<synchronous>, transform_indices = @transform_6, window_bounds = array<i64: 16, 1>}, {transform_indices = @transform_7, window_bounds = array<i64: 1, 16, 64>}]} {
    %cst = arith.constant 0.000000e+00 : f32
    %0 = vector.broadcast %cst : f32 to vector<4x342xf32>
    %c0 = arith.constant 0 : index
    %c0_0 = arith.constant 0 : index
    %1 = vector.load %arg9[%c0, %c0_0] : memref<4x342xf32, #tpu.memory_space<vmem>>, vector<4x342xf32>
    tpu.vector_store %arg9[%c0, %c0_0], %0 {strides = array<i32>} : memref<4x342xf32, #tpu.memory_space<vmem>>, vector<4x342xf32>,
    %cst_1 = arith.constant 0.000000e+00 : f32
    %2 = vector.broadcast %cst_1 : f32 to vector<8x96xf32>
    %c0_2 = arith.constant 0 : index
    %c0_3 = arith.constant 0 : index
    %3 = vector.load %arg10[%c0_2, %c0_3] : memref<8x96xf32, #tpu.memory_space<vmem>>, vector<8x96xf32>
    tpu.vector_store %arg10[%c0_2, %c0_3], %2 {strides = array<i32>} : memref<8x96xf32, #tpu.memory_space<vmem>>, vector<8x96xf32>,
    %cst_4 = arith.constant 0.000000e+00 : f32
    %4 = vector.broadcast %cst_4 : f32 to vector<8x96xf32>
    %c0_5 = arith.constant 0 : index
    %c0_6 = arith.constant 0 : index
    %5 = vector.load %arg11[%c0_5, %c0_6] : memref<8x96xf32, #tpu.memory_space<vmem>>, vector<8x96xf32>
    tpu.vector_store %arg11[%c0_5, %c0_6], %4 {strides = array<i32>} : memref<8x96xf32, #tpu.memory_space<vmem>>, vector<8x96xf32>,
    %c0_7 = arith.constant 0 : index
    %c0_8 = arith.constant 0 : index
    %c0_9 = arith.constant 0 : index
    %c0_10 = arith.constant 0 : index
    %6 = vector.load %arg1[%c0_7, %c0_8, %c0_9, %c0_10] : memref<1x4x16x16xf32, #tpu.memory_space<vmem>>, vector<1x4x16x16xf32>
    %7 = vector.shape_cast %6 : vector<1x4x16x16xf32> to vector<4x16x16xf32>
    %8 = vector.shape_cast %7 : vector<4x16x16xf32> to vector<64x16xf32>
    %c0_11 = arith.constant 0 : index
    %c0_12 = arith.constant 0 : index
    %9 = vector.load %arg3[%c0_11, %c0_12] : memref<16x18xf32, #tpu.memory_space<vmem>>, vector<16x18xf32>
    %cst_13 = arith.constant dense<0.000000e+00> : vector<64x18xf32>
    %10 = tpu.matmul %8, %9, %cst_13 {dimension_numbers = #tpu.dot_dimension_numbers<[1], [0], [0], [1], [0, 0, 1, 1], [], []>} : vector<64x16xf32>, vector<16x18xf32>, vector<64x18xf32> -> vector<64x18xf32>
    %11 = vector.shape_cast %10 : vector<64x18xf32> to vector<4x16x18xf32>
    %12 = vector.extract_strided_slice %11 {offsets = [0, 0, 0], sizes = [4, 1, 18], strides = [1, 1, 1]} : vector<4x16x18xf32> to vector<4x1x18xf32>
    %13 = vector.shape_cast %12 : vector<4x1x18xf32> to vector<4x18xf32>
    %c0_14 = arith.constant 0 : index
    %c18 = arith.constant 18 : index
    %14 = vector.load %arg9[%c0_14, %c18] : memref<4x342xf32, #tpu.memory_space<vmem>>, vector<4x18xf32>
    tpu.vector_store %arg9[%c0_14, %c18], %13 {strides = array<i32>} : memref<4x342xf32, #tpu.memory_space<vmem>>, vector<4x18xf32>,
    %15 = vector.extract_strided_slice %11 {offsets = [0, 1, 0], sizes = [4, 1, 18], strides = [1, 1, 1]} : vector<4x16x18xf32> to vector<4x1x18xf32>
    %16 = vector.shape_cast %15 : vector<4x1x18xf32> to vector<4x18xf32>
    %c0_15 = arith.constant 0 : index
    %c36 = arith.constant 36 : index
    %17 = vector.load %arg9[%c0_15, %c36] : memref<4x342xf32, #tpu.memory_space<vmem>>, vector<4x18xf32>
    tpu.vector_store %arg9[%c0_15, %c36], %16 {strides = array<i32>} : memref<4x342xf32, #tpu.memory_space<vmem>>, vector<4x18xf32>,
    %18 = vector.extract_strided_slice %11 {offsets = [0, 2, 0], sizes = [4, 1, 18], strides = [1, 1, 1]} : vector<4x16x18xf32> to vector<4x1x18xf32>
    %19 = vector.shape_cast %18 : vector<4x1x18xf32> to vector<4x18xf32>
    %c0_16 = arith.constant 0 : index
    %c54 = arith.constant 54 : index
    %20 = vector.load %arg9[%c0_16, %c54] : memref<4x342xf32, #tpu.memory_space<vmem>>, vector<4x18xf32>
    tpu.vector_store %arg9[%c0_16, %c54], %19 {strides = array<i32>} : memref<4x342xf32, #tpu.memory_space<vmem>>, vector<4x18xf32>,
    %21 = vector.extract_strided_slice %11 {offsets = [0, 3, 0], sizes = [4, 1, 18], strides = [1, 1, 1]} : vector<4x16x18xf32> to vector<4x1x18xf32>
    %22 = vector.shape_cast %21 : vector<4x1x18xf32> to vector<4x18xf32>
    %c0_17 = arith.constant 0 : index
    %c72 = arith.constant 72 : index
    %23 = vector.load %arg9[%c0_17, %c72] : memref<4x342xf32, #tpu.memory_space<vmem>>, vector<4x18xf32>
    tpu.vector_store %arg9[%c0_17, %c72], %22 {strides = array<i32>} : memref<4x342xf32, #tpu.memory_space<vmem>>, vector<4x18xf32>,
    %24 = vector.extract_strided_slice %11 {offsets = [0, 4, 0], sizes = [4, 1, 18], strides = [1, 1, 1]} : vector<4x16x18xf32> to vector<4x1x18xf32>
    %25 = vector.shape_cast %24 : vector<4x1x18xf32> to vector<4x18xf32>
    %c0_18 = arith.constant 0 : index
    %c90 = arith.constant 90 : index
    %26 = vector.load %arg9[%c0_18, %c90] : memref<4x342xf32, #tpu.memory_space<vmem>>, vector<4x18xf32>
    tpu.vector_store %arg9[%c0_18, %c90], %25 {strides = array<i32>} : memref<4x342xf32, #tpu.memory_space<vmem>>, vector<4x18xf32>,
    %27 = vector.extract_strided_slice %11 {offsets = [0, 5, 0], sizes = [4, 1, 18], strides = [1, 1, 1]} : vector<4x16x18xf32> to vector<4x1x18xf32>
    %28 = vector.shape_cast %27 : vector<4x1x18xf32> to vector<4x18xf32>
    %c0_19 = arith.constant 0 : index
    %c108 = arith.constant 108 : index
    %29 = vector.load %arg9[%c0_19, %c108] : memref<4x342xf32, #tpu.memory_space<vmem>>, vector<4x18xf32>
    tpu.vector_store %arg9[%c0_19, %c108], %28 {strides = array<i32>} : memref<4x342xf32, #tpu.memory_space<vmem>>, vector<4x18xf32>,
    %30 = vector.extract_strided_slice %11 {offsets = [0, 6, 0], sizes = [4, 1, 18], strides = [1, 1, 1]} : vector<4x16x18xf32> to vector<4x1x18xf32>
    %31 = vector.shape_cast %30 : vector<4x1x18xf32> to vector<4x18xf32>
    %c0_20 = arith.constant 0 : index
    %c126 = arith.constant 126 : index
    %32 = vector.load %arg9[%c0_20, %c126] : memref<4x342xf32, #tpu.memory_space<vmem>>, vector<4x18xf32>
    tpu.vector_store %arg9[%c0_20, %c126], %31 {strides = array<i32>} : memref<4x342xf32, #tpu.memory_space<vmem>>, vector<4x18xf32>,
    %33 = vector.extract_strided_slice %11 {offsets = [0, 7, 0], sizes = [4, 1, 18], strides = [1, 1, 1]} : vector<4x16x18xf32> to vector<4x1x18xf32>
    %34 = vector.shape_cast %33 : vector<4x1x18xf32> to vector<4x18xf32>
    %c0_21 = arith.constant 0 : index
    %c144 = arith.constant 144 : index
    %35 = vector.load %arg9[%c0_21, %c144] : memref<4x342xf32, #tpu.memory_space<vmem>>, vector<4x18xf32>
    tpu.vector_store %arg9[%c0_21, %c144], %34 {strides = array<i32>} : memref<4x342xf32, #tpu.memory_space<vmem>>, vector<4x18xf32>,
    %36 = vector.extract_strided_slice %11 {offsets = [0, 8, 0], sizes = [4, 1, 18], strides = [1, 1, 1]} : vector<4x16x18xf32> to vector<4x1x18xf32>
    %37 = vector.shape_cast %36 : vector<4x1x18xf32> to vector<4x18xf32>
    %c0_22 = arith.constant 0 : index
    %c162 = arith.constant 162 : index
    %38 = vector.load %arg9[%c0_22, %c162] : memref<4x342xf32, #tpu.memory_space<vmem>>, vector<4x18xf32>
    tpu.vector_store %arg9[%c0_22, %c162], %37 {strides = array<i32>} : memref<4x342xf32, #tpu.memory_space<vmem>>, vector<4x18xf32>,
    %39 = vector.extract_strided_slice %11 {offsets = [0, 9, 0], sizes = [4, 1, 18], strides = [1, 1, 1]} : vector<4x16x18xf32> to vector<4x1x18xf32>
    %40 = vector.shape_cast %39 : vector<4x1x18xf32> to vector<4x18xf32>
    %c0_23 = arith.constant 0 : index
    %c180 = arith.constant 180 : index
    %41 = vector.load %arg9[%c0_23, %c180] : memref<4x342xf32, #tpu.memory_space<vmem>>, vector<4x18xf32>
    tpu.vector_store %arg9[%c0_23, %c180], %40 {strides = array<i32>} : memref<4x342xf32, #tpu.memory_space<vmem>>, vector<4x18xf32>,
    %42 = vector.extract_strided_slice %11 {offsets = [0, 10, 0], sizes = [4, 1, 18], strides = [1, 1, 1]} : vector<4x16x18xf32> to vector<4x1x18xf32>
    %43 = vector.shape_cast %42 : vector<4x1x18xf32> to vector<4x18xf32>
    %c0_24 = arith.constant 0 : index
    %c198 = arith.constant 198 : index
    %44 = vector.load %arg9[%c0_24, %c198] : memref<4x342xf32, #tpu.memory_space<vmem>>, vector<4x18xf32>
    tpu.vector_store %arg9[%c0_24, %c198], %43 {strides = array<i32>} : memref<4x342xf32, #tpu.memory_space<vmem>>, vector<4x18xf32>,
    %45 = vector.extract_strided_slice %11 {offsets = [0, 11, 0], sizes = [4, 1, 18], strides = [1, 1, 1]} : vector<4x16x18xf32> to vector<4x1x18xf32>
    %46 = vector.shape_cast %45 : vector<4x1x18xf32> to vector<4x18xf32>
    %c0_25 = arith.constant 0 : index
    %c216 = arith.constant 216 : index
    %47 = vector.load %arg9[%c0_25, %c216] : memref<4x342xf32, #tpu.memory_space<vmem>>, vector<4x18xf32>
    tpu.vector_store %arg9[%c0_25, %c216], %46 {strides = array<i32>} : memref<4x342xf32, #tpu.memory_space<vmem>>, vector<4x18xf32>,
    %48 = vector.extract_strided_slice %11 {offsets = [0, 12, 0], sizes = [4, 1, 18], strides = [1, 1, 1]} : vector<4x16x18xf32> to vector<4x1x18xf32>
    %49 = vector.shape_cast %48 : vector<4x1x18xf32> to vector<4x18xf32>
    %c0_26 = arith.constant 0 : index
    %c234 = arith.constant 234 : index
    %50 = vector.load %arg9[%c0_26, %c234] : memref<4x342xf32, #tpu.memory_space<vmem>>, vector<4x18xf32>
    tpu.vector_store %arg9[%c0_26, %c234], %49 {strides = array<i32>} : memref<4x342xf32, #tpu.memory_space<vmem>>, vector<4x18xf32>,
    %51 = vector.extract_strided_slice %11 {offsets = [0, 13, 0], sizes = [4, 1, 18], strides = [1, 1, 1]} : vector<4x16x18xf32> to vector<4x1x18xf32>
    %52 = vector.shape_cast %51 : vector<4x1x18xf32> to vector<4x18xf32>
    %c0_27 = arith.constant 0 : index
    %c252 = arith.constant 252 : index
    %53 = vector.load %arg9[%c0_27, %c252] : memref<4x342xf32, #tpu.memory_space<vmem>>, vector<4x18xf32>
    tpu.vector_store %arg9[%c0_27, %c252], %52 {strides = array<i32>} : memref<4x342xf32, #tpu.memory_space<vmem>>, vector<4x18xf32>,
    %54 = vector.extract_strided_slice %11 {offsets = [0, 14, 0], sizes = [4, 1, 18], strides = [1, 1, 1]} : vector<4x16x18xf32> to vector<4x1x18xf32>
    %55 = vector.shape_cast %54 : vector<4x1x18xf32> to vector<4x18xf32>
    %c0_28 = arith.constant 0 : index
    %c270 = arith.constant 270 : index
    %56 = vector.load %arg9[%c0_28, %c270] : memref<4x342xf32, #tpu.memory_space<vmem>>, vector<4x18xf32>
    tpu.vector_store %arg9[%c0_28, %c270], %55 {strides = array<i32>} : memref<4x342xf32, #tpu.memory_space<vmem>>, vector<4x18xf32>,
    %57 = vector.extract_strided_slice %11 {offsets = [0, 15, 0], sizes = [4, 1, 18], strides = [1, 1, 1]} : vector<4x16x18xf32> to vector<4x1x18xf32>
    %58 = vector.shape_cast %57 : vector<4x1x18xf32> to vector<4x18xf32>
    %c0_29 = arith.constant 0 : index
    %c288 = arith.constant 288 : index
    %59 = vector.load %arg9[%c0_29, %c288] : memref<4x342xf32, #tpu.memory_space<vmem>>, vector<4x18xf32>
    tpu.vector_store %arg9[%c0_29, %c288], %58 {strides = array<i32>} : memref<4x342xf32, #tpu.memory_space<vmem>>, vector<4x18xf32>,
    %c0_30 = arith.constant 0 : index
    %c0_31 = arith.constant 0 : index
    %60 = vector.load %arg9[%c0_30, %c0_31] : memref<4x342xf32, #tpu.memory_space<vmem>>, vector<4x288xf32>
    %c0_32 = arith.constant 0 : index
    %c9 = arith.constant 9 : index
    %61 = vector.load %arg9[%c0_32, %c9] : memref<4x342xf32, #tpu.memory_space<vmem>>, vector<4x288xf32>
    %c0_33 = arith.constant 0 : index
    %c1 = arith.constant 1 : index
    %62 = vector.load %arg9[%c0_33, %c1] : memref<4x342xf32, #tpu.memory_space<vmem>>, vector<4x288xf32>
    %c0_34 = arith.constant 0 : index
    %c18_35 = arith.constant 18 : index
    %63 = vector.load %arg9[%c0_34, %c18_35] : memref<4x342xf32, #tpu.memory_space<vmem>>, vector<4x288xf32>
    %c0_36 = arith.constant 0 : index
    %c27 = arith.constant 27 : index
    %64 = vector.load %arg9[%c0_36, %c27] : memref<4x342xf32, #tpu.memory_space<vmem>>, vector<4x288xf32>
    %c0_37 = arith.constant 0 : index
    %c19 = arith.constant 19 : index
    %65 = vector.load %arg9[%c0_37, %c19] : memref<4x342xf32, #tpu.memory_space<vmem>>, vector<4x288xf32>
    %c0_38 = arith.constant 0 : index
    %c36_39 = arith.constant 36 : index
    %66 = vector.load %arg9[%c0_38, %c36_39] : memref<4x342xf32, #tpu.memory_space<vmem>>, vector<4x288xf32>
    %c0_40 = arith.constant 0 : index
    %c45 = arith.constant 45 : index
    %67 = vector.load %arg9[%c0_40, %c45] : memref<4x342xf32, #tpu.memory_space<vmem>>, vector<4x288xf32>
    %c0_41 = arith.constant 0 : index
    %c37 = arith.constant 37 : index
    %68 = vector.load %arg9[%c0_41, %c37] : memref<4x342xf32, #tpu.memory_space<vmem>>, vector<4x288xf32>
    %69 = tpu.concatenate %60, %61, %62, %63, %64, %65, %66, %67, %68 in 0 : vector<4x288xf32>, vector<4x288xf32>, vector<4x288xf32>, vector<4x288xf32>, vector<4x288xf32>, vector<4x288xf32>, vector<4x288xf32>, vector<4x288xf32>, vector<4x288xf32> -> vector<36x288xf32>
    %c0_42 = arith.constant 0 : index
    %c0_43 = arith.constant 0 : index
    %70 = vector.load %arg4[%c0_42, %c0_43] : memref<8x36xf32, #tpu.memory_space<vmem>>, vector<8x36xf32>
    %cst_44 = arith.constant dense<0.000000e+00> : vector<8x288xf32>
    %71 = tpu.matmul %70, %69, %cst_44 {dimension_numbers = #tpu.dot_dimension_numbers<[1], [0], [0], [1], [0, 0, 1, 1], [], []>} : vector<8x36xf32>, vector<36x288xf32>, vector<8x288xf32> -> vector<8x288xf32>
    %c0_45 = arith.constant 0 : index
    %c0_46 = arith.constant 0 : index
    %72 = vector.load %arg5[%c0_45, %c0_46] : memref<8x1xf32, #tpu.memory_space<vmem>>, vector<8x1xf32>
    %73 = vector.broadcast %72 : vector<8x1xf32> to vector<8x288xf32>
    %74 = arith.addf %71, %73 : vector<8x288xf32>
    %cst_47 = arith.constant 0.00999999977 : f32
    %75 = vector.broadcast %cst_47 : f32 to vector<8x288xf32>
    %76 = arith.mulf %75, %74 : vector<8x288xf32>
    %77 = arith.maximumf %74, %76 : vector<8x288xf32>
    %78 = vector.extract_strided_slice %77 {offsets = [0, 0], sizes = [8, 8], strides = [1, 1]} : vector<8x288xf32> to vector<8x8xf32>
    %c0_48 = arith.constant 0 : index
    %c9_49 = arith.constant 9 : index
    %79 = vector.load %arg10[%c0_48, %c9_49] : memref<8x96xf32, #tpu.memory_space<vmem>>, vector<8x8xf32>
    tpu.vector_store %arg10[%c0_48, %c9_49], %78 {strides = array<i32>} : memref<8x96xf32, #tpu.memory_space<vmem>>, vector<8x8xf32>,
    %80 = vector.extract_strided_slice %77 {offsets = [0, 36], sizes = [8, 8], strides = [1, 1]} : vector<8x288xf32> to vector<8x8xf32>
    %c0_50 = arith.constant 0 : index
    %c17 = arith.constant 17 : index
    %81 = vector.load %arg10[%c0_50, %c17] : memref<8x96xf32, #tpu.memory_space<vmem>>, vector<8x8xf32>
    tpu.vector_store %arg10[%c0_50, %c17], %80 {strides = array<i32>} : memref<8x96xf32, #tpu.memory_space<vmem>>, vector<8x8xf32>,
    %82 = vector.extract_strided_slice %77 {offsets = [0, 72], sizes = [8, 8], strides = [1, 1]} : vector<8x288xf32> to vector<8x8xf32>
    %c0_51 = arith.constant 0 : index
    %c25 = arith.constant 25 : index
    %83 = vector.load %arg10[%c0_51, %c25] : memref<8x96xf32, #tpu.memory_space<vmem>>, vector<8x8xf32>
    tpu.vector_store %arg10[%c0_51, %c25], %82 {strides = array<i32>} : memref<8x96xf32, #tpu.memory_space<vmem>>, vector<8x8xf32>,
    %84 = vector.extract_strided_slice %77 {offsets = [0, 108], sizes = [8, 8], strides = [1, 1]} : vector<8x288xf32> to vector<8x8xf32>
    %c0_52 = arith.constant 0 : index
    %c33 = arith.constant 33 : index
    %85 = vector.load %arg10[%c0_52, %c33] : memref<8x96xf32, #tpu.memory_space<vmem>>, vector<8x8xf32>
    tpu.vector_store %arg10[%c0_52, %c33], %84 {strides = array<i32>} : memref<8x96xf32, #tpu.memory_space<vmem>>, vector<8x8xf32>,
    %86 = vector.extract_strided_slice %77 {offsets = [0, 144], sizes = [8, 8], strides = [1, 1]} : vector<8x288xf32> to vector<8x8xf32>
    %c0_53 = arith.constant 0 : index
    %c41 = arith.constant 41 : index
    %87 = vector.load %arg10[%c0_53, %c41] : memref<8x96xf32, #tpu.memory_space<vmem>>, vector<8x8xf32>
    tpu.vector_store %arg10[%c0_53, %c41], %86 {strides = array<i32>} : memref<8x96xf32, #tpu.memory_space<vmem>>, vector<8x8xf32>,
    %88 = vector.extract_strided_slice %77 {offsets = [0, 180], sizes = [8, 8], strides = [1, 1]} : vector<8x288xf32> to vector<8x8xf32>
    %c0_54 = arith.constant 0 : index
    %c49 = arith.constant 49 : index
    %89 = vector.load %arg10[%c0_54, %c49] : memref<8x96xf32, #tpu.memory_space<vmem>>, vector<8x8xf32>
    tpu.vector_store %arg10[%c0_54, %c49], %88 {strides = array<i32>} : memref<8x96xf32, #tpu.memory_space<vmem>>, vector<8x8xf32>,
    %90 = vector.extract_strided_slice %77 {offsets = [0, 216], sizes = [8, 8], strides = [1, 1]} : vector<8x288xf32> to vector<8x8xf32>
    %c0_55 = arith.constant 0 : index
    %c57 = arith.constant 57 : index
    %91 = vector.load %arg10[%c0_55, %c57] : memref<8x96xf32, #tpu.memory_space<vmem>>, vector<8x8xf32>
    tpu.vector_store %arg10[%c0_55, %c57], %90 {strides = array<i32>} : memref<8x96xf32, #tpu.memory_space<vmem>>, vector<8x8xf32>,
    %92 = vector.extract_strided_slice %77 {offsets = [0, 252], sizes = [8, 8], strides = [1, 1]} : vector<8x288xf32> to vector<8x8xf32>
    %c0_56 = arith.constant 0 : index
    %c65 = arith.constant 65 : index
    %93 = vector.load %arg10[%c0_56, %c65] : memref<8x96xf32, #tpu.memory_space<vmem>>, vector<8x8xf32>
    tpu.vector_store %arg10[%c0_56, %c65], %92 {strides = array<i32>} : memref<8x96xf32, #tpu.memory_space<vmem>>, vector<8x8xf32>,
    %c0_57 = arith.constant 0 : index
    %c0_58 = arith.constant 0 : index
    %c0_59 = arith.constant 0 : index
    %94 = vector.load %arg2[%c0_57, %c0_58, %c0_59] : memref<1x8x64xf32, #tpu.memory_space<vmem>>, vector<1x8x64xf32>
    %95 = vector.shape_cast %94 : vector<1x8x64xf32> to vector<8x64xf32>
    %c0_60 = arith.constant 0 : index
    %c9_61 = arith.constant 9 : index
    %96 = vector.load %arg11[%c0_60, %c9_61] : memref<8x96xf32, #tpu.memory_space<vmem>>, vector<8x64xf32>
    tpu.vector_store %arg11[%c0_60, %c9_61], %95 {strides = array<i32>} : memref<8x96xf32, #tpu.memory_space<vmem>>, vector<8x64xf32>,
    %97 = tpu.iota {dimensions = array<i32: 1>} : vector<1x64xi32>
    %c8_i32 = arith.constant 8 : i32
    %c0_i32 = arith.constant 0 : i32
    %98 = arith.cmpi eq, %c8_i32, %c0_i32 : i32
    %c1_i32 = arith.constant 1 : i32
    %99 = arith.select %98, %c1_i32, %c8_i32 : i32
    %100 = vector.broadcast %99 : i32 to vector<1x64xi32>
    %101 = arith.remsi %97, %100 : vector<1x64xi32>
    %c0_i32_62 = arith.constant 0 : i32
    %102 = vector.broadcast %c0_i32_62 : i32 to vector<1x64xi32>
    %103 = arith.cmpi ne, %101, %102 : vector<1x64xi32>
    %c0_i32_63 = arith.constant 0 : i32
    %104 = vector.broadcast %c0_i32_63 : i32 to vector<1x64xi32>
    %105 = arith.cmpi slt, %101, %104 : vector<1x64xi32>
    %c0_i32_64 = arith.constant 0 : i32
    %106 = arith.cmpi slt, %99, %c0_i32_64 : i32
    %107 = vector.broadcast %106 : i1 to vector<1x64xi1>
    %108 = vector.broadcast %107 : vector<1x64xi1> to vector<1x64xi1>
    %109 = arith.xori %105, %108 : vector<1x64xi1>
    %110 = arith.andi %109, %103 : vector<1x64xi1>
    %111 = vector.broadcast %99 : i32 to vector<1x64xi32>
    %112 = arith.addi %101, %111 : vector<1x64xi32>
    %113 = arith.select %110, %112, %101 : vector<1x64xi1>, vector<1x64xi32>
    %c0_i32_65 = arith.constant 0 : i32
    %114 = vector.broadcast %c0_i32_65 : i32 to vector<1x64xi32>
    %115 = arith.cmpi ne, %113, %114 : vector<1x64xi32>
    %116 = arith.extui %115 : vector<1x64xi1> to vector<1x64xi32>
    %117 = arith.sitofp %116 : vector<1x64xi32> to vector<1x64xf32>
    %c7_i32 = arith.constant 7 : i32
    %118 = vector.broadcast %c7_i32 : i32 to vector<1x64xi32>
    %119 = arith.cmpi ne, %113, %118 : vector<1x64xi32>
    %120 = arith.extui %119 : vector<1x64xi1> to vector<1x64xi32>
    %121 = arith.sitofp %120 : vector<1x64xi32> to vector<1x64xf32>
    %c0_66 = arith.constant 0 : index
    %c0_67 = arith.constant 0 : index
    %122 = vector.load %arg10[%c0_66, %c0_67] : memref<8x96xf32, #tpu.memory_space<vmem>>, vector<8x64xf32>
    %123 = vector.broadcast %117 : vector<1x64xf32> to vector<8x64xf32>
    %124 = arith.mulf %122, %123 : vector<8x64xf32>
    %c0_68 = arith.constant 0 : index
    %c1_69 = arith.constant 1 : index
    %125 = vector.load %arg10[%c0_68, %c1_69] : memref<8x96xf32, #tpu.memory_space<vmem>>, vector<8x64xf32>
    %c0_70 = arith.constant 0 : index
    %c2 = arith.constant 2 : index
    %126 = vector.load %arg10[%c0_70, %c2] : memref<8x96xf32, #tpu.memory_space<vmem>>, vector<8x64xf32>
    %127 = vector.broadcast %121 : vector<1x64xf32> to vector<8x64xf32>
    %128 = arith.mulf %126, %127 : vector<8x64xf32>
    %c0_71 = arith.constant 0 : index
    %c8 = arith.constant 8 : index
    %129 = vector.load %arg10[%c0_71, %c8] : memref<8x96xf32, #tpu.memory_space<vmem>>, vector<8x64xf32>
    %130 = vector.broadcast %117 : vector<1x64xf32> to vector<8x64xf32>
    %131 = arith.mulf %129, %130 : vector<8x64xf32>
    %c0_72 = arith.constant 0 : index
    %c9_73 = arith.constant 9 : index
    %132 = vector.load %arg10[%c0_72, %c9_73] : memref<8x96xf32, #tpu.memory_space<vmem>>, vector<8x64xf32>
    %c0_74 = arith.constant 0 : index
    %c10 = arith.constant 10 : index
    %133 = vector.load %arg10[%c0_74, %c10] : memref<8x96xf32, #tpu.memory_space<vmem>>, vector<8x64xf32>
    %134 = vector.broadcast %121 : vector<1x64xf32> to vector<8x64xf32>
    %135 = arith.mulf %133, %134 : vector<8x64xf32>
    %c0_75 = arith.constant 0 : index
    %c16 = arith.constant 16 : index
    %136 = vector.load %arg10[%c0_75, %c16] : memref<8x96xf32, #tpu.memory_space<vmem>>, vector<8x64xf32>
    %137 = vector.broadcast %117 : vector<1x64xf32> to vector<8x64xf32>
    %138 = arith.mulf %136, %137 : vector<8x64xf32>
    %c0_76 = arith.constant 0 : index
    %c17_77 = arith.constant 17 : index
    %139 = vector.load %arg10[%c0_76, %c17_77] : memref<8x96xf32, #tpu.memory_space<vmem>>, vector<8x64xf32>
    %c0_78 = arith.constant 0 : index
    %c18_79 = arith.constant 18 : index
    %140 = vector.load %arg10[%c0_78, %c18_79] : memref<8x96xf32, #tpu.memory_space<vmem>>, vector<8x64xf32>
    %141 = vector.broadcast %121 : vector<1x64xf32> to vector<8x64xf32>
    %142 = arith.mulf %140, %141 : vector<8x64xf32>
    %c0_80 = arith.constant 0 : index
    %c0_81 = arith.constant 0 : index
    %143 = vector.load %arg11[%c0_80, %c0_81] : memref<8x96xf32, #tpu.memory_space<vmem>>, vector<8x64xf32>
    %144 = vector.broadcast %117 : vector<1x64xf32> to vector<8x64xf32>
    %145 = arith.mulf %143, %144 : vector<8x64xf32>
    %c0_82 = arith.constant 0 : index
    %c1_83 = arith.constant 1 : index
    %146 = vector.load %arg11[%c0_82, %c1_83] : memref<8x96xf32, #tpu.memory_space<vmem>>, vector<8x64xf32>
    %c0_84 = arith.constant 0 : index
    %c2_85 = arith.constant 2 : index
    %147 = vector.load %arg11[%c0_84, %c2_85] : memref<8x96xf32, #tpu.memory_space<vmem>>, vector<8x64xf32>
    %148 = vector.broadcast %121 : vector<1x64xf32> to vector<8x64xf32>
    %149 = arith.mulf %147, %148 : vector<8x64xf32>
    %c0_86 = arith.constant 0 : index
    %c8_87 = arith.constant 8 : index
    %150 = vector.load %arg11[%c0_86, %c8_87] : memref<8x96xf32, #tpu.memory_space<vmem>>, vector<8x64xf32>
    %151 = vector.broadcast %117 : vector<1x64xf32> to vector<8x64xf32>
    %152 = arith.mulf %150, %151 : vector<8x64xf32>
    %c0_88 = arith.constant 0 : index
    %c9_89 = arith.constant 9 : index
    %153 = vector.load %arg11[%c0_88, %c9_89] : memref<8x96xf32, #tpu.memory_space<vmem>>, vector<8x64xf32>
    %c0_90 = arith.constant 0 : index
    %c10_91 = arith.constant 10 : index
    %154 = vector.load %arg11[%c0_90, %c10_91] : memref<8x96xf32, #tpu.memory_space<vmem>>, vector<8x64xf32>
    %155 = vector.broadcast %121 : vector<1x64xf32> to vector<8x64xf32>
    %156 = arith.mulf %154, %155 : vector<8x64xf32>
    %c0_92 = arith.constant 0 : index
    %c16_93 = arith.constant 16 : index
    %157 = vector.load %arg11[%c0_92, %c16_93] : memref<8x96xf32, #tpu.memory_space<vmem>>, vector<8x64xf32>
    %158 = vector.broadcast %117 : vector<1x64xf32> to vector<8x64xf32>
    %159 = arith.mulf %157, %158 : vector<8x64xf32>
    %c0_94 = arith.constant 0 : index
    %c17_95 = arith.constant 17 : index
    %160 = vector.load %arg11[%c0_94, %c17_95] : memref<8x96xf32, #tpu.memory_space<vmem>>, vector<8x64xf32>
    %c0_96 = arith.constant 0 : index
    %c18_97 = arith.constant 18 : index
    %161 = vector.load %arg11[%c0_96, %c18_97] : memref<8x96xf32, #tpu.memory_space<vmem>>, vector<8x64xf32>
    %162 = vector.broadcast %121 : vector<1x64xf32> to vector<8x64xf32>
    %163 = arith.mulf %161, %162 : vector<8x64xf32>
    %164 = tpu.concatenate %124, %125, %128, %131, %132, %135, %138, %139, %142, %145, %146, %149, %152, %153, %156, %159 in 0 : vector<8x64xf32>, vector<8x64xf32>, vector<8x64xf32>, vector<8x64xf32>, vector<8x64xf32>, vector<8x64xf32>, vector<8x64xf32>, vector<8x64xf32>, vector<8x64xf32>, vector<8x64xf32>, vector<8x64xf32>, vector<8x64xf32>, vector<8x64xf32>, vector<8x64xf32>, vector<8x64xf32>, vector<8x64xf32> -> vector<128x64xf32>
    %165 = tpu.concatenate %160, %163 in 0 : vector<8x64xf32>, vector<8x64xf32> -> vector<16x64xf32>
    %166 = tpu.concatenate %164, %165 in 0 : vector<128x64xf32>, vector<16x64xf32> -> vector<144x64xf32>
    %c0_98 = arith.constant 0 : index
    %c0_99 = arith.constant 0 : index
    %167 = vector.load %arg6[%c0_98, %c0_99] : memref<16x144xf32, #tpu.memory_space<vmem>>, vector<16x144xf32>
    %cst_100 = arith.constant dense<0.000000e+00> : vector<16x64xf32>
    %168 = tpu.matmul %167, %166, %cst_100 {dimension_numbers = #tpu.dot_dimension_numbers<[1], [0], [0], [1], [0, 0, 1, 1], [], []>} : vector<16x144xf32>, vector<144x64xf32>, vector<16x64xf32> -> vector<16x64xf32>
    %c0_101 = arith.constant 0 : index
    %c0_102 = arith.constant 0 : index
    %169 = vector.load %arg7[%c0_101, %c0_102] : memref<16x1xf32, #tpu.memory_space<vmem>>, vector<16x1xf32>
    %170 = vector.broadcast %169 : vector<16x1xf32> to vector<16x64xf32>
    %171 = arith.addf %168, %170 : vector<16x64xf32>
    %cst_103 = arith.constant 0.00999999977 : f32
    %172 = vector.broadcast %cst_103 : f32 to vector<16x64xf32>
    %173 = arith.mulf %172, %171 : vector<16x64xf32>
    %174 = arith.maximumf %171, %173 : vector<16x64xf32>
    %c0_104 = arith.constant 0 : index
    %c0_105 = arith.constant 0 : index
    %c0_106 = arith.constant 0 : index
    %175 = vector.load %arg8[%c0_104, %c0_105, %c0_106] : memref<1x16x64xf32, #tpu.memory_space<vmem>>, vector<1x16x64xf32>
    %176 = vector.shape_cast %175 : vector<1x16x64xf32> to vector<16x64xf32>
    %177 = vector.shape_cast %174 : vector<16x64xf32> to vector<1x16x64xf32>
    tpu.vector_store %arg8[%c0_104, %c0_105, %c0_106], %177 {strides = array<i32>} : memref<1x16x64xf32, #tpu.memory_space<vmem>>, vector<1x16x64xf32>,
    return
  }
  func.func @transform_0(%arg0: i32) -> (i32, i32, i32, i32) {
    %c0_i32 = arith.constant 0 : i32
    %c0_i32_0 = arith.constant 0 : i32
    %c0_i32_1 = arith.constant 0 : i32
    %c0_i32_2 = arith.constant 0 : i32
    return %arg0, %c0_i32, %c0_i32_0, %c0_i32_1 : i32, i32, i32, i32
  }
  func.func @transform_1(%arg0: i32) -> (i32, i32, i32) {
    %c0_i32 = arith.constant 0 : i32
    %c0_i32_0 = arith.constant 0 : i32
    %c0_i32_1 = arith.constant 0 : i32
    return %arg0, %c0_i32, %c0_i32_0 : i32, i32, i32
  }
  func.func @transform_2(%arg0: i32) -> (i32, i32) {
    %c0_i32 = arith.constant 0 : i32
    %c0_i32_0 = arith.constant 0 : i32
    %c0_i32_1 = arith.constant 0 : i32
    return %c0_i32, %c0_i32_0 : i32, i32
  }
  func.func @transform_3(%arg0: i32) -> (i32, i32) {
    %c0_i32 = arith.constant 0 : i32
    %c0_i32_0 = arith.constant 0 : i32
    %c0_i32_1 = arith.constant 0 : i32
    return %c0_i32, %c0_i32_0 : i32, i32
  }
  func.func @transform_4(%arg0: i32) -> (i32, i32) {
    %c0_i32 = arith.constant 0 : i32
    %c0_i32_0 = arith.constant 0 : i32
    %c0_i32_1 = arith.constant 0 : i32
    return %c0_i32, %c0_i32_0 : i32, i32
  }
  func.func @transform_5(%arg0: i32) -> (i32, i32) {
    %c0_i32 = arith.constant 0 : i32
    %c0_i32_0 = arith.constant 0 : i32
    %c0_i32_1 = arith.constant 0 : i32
    return %c0_i32, %c0_i32_0 : i32, i32
  }
  func.func @transform_6(%arg0: i32) -> (i32, i32) {
    %c0_i32 = arith.constant 0 : i32
    %c0_i32_0 = arith.constant 0 : i32
    %c0_i32_1 = arith.constant 0 : i32
    return %c0_i32, %c0_i32_0 : i32, i32
  }
  func.func @transform_7(%arg0: i32) -> (i32, i32, i32) {
    %c0_i32 = arith.constant 0 : i32
    %c0_i32_0 = arith.constant 0 : i32
    %c0_i32_1 = arith.constant 0 : i32
    return %arg0, %c0_i32, %c0_i32_0 : i32, i32, i32
  }
}

</mosaic_0001>

<bundles_post_ra>
// kernel: tpu_custom_call.1
= control target key start
LH: loop header
LB: loop body
LE: loop exit
PB: predicated region body
PF: predicated region fallthrough
CT: control target
= control target key end

     0   :  { %s2605_s0 = inlined_call_operand.hbm [shape: f32[2,4,16,16], index: 0, kind: input, shape index: {}]   ;;  %s2606_s1 = inlined_call_operand.hbm [shape: f32[2,8,64], index: 1, kind: input, shape index: {}]   ;;  %s2607_s2 = inlined_call_operand.hbm [shape: f32[16,18], index: 2, kind: input, shape index: {}]   ;;  %s2608_s3 = inlined_call_operand.vmem [shape: f32[8,36], index: 3, kind: input, shape index: {}]   ;;  %s2609_s4 = inlined_call_operand.vmem [shape: f32[8,1], index: 4, kind: input, shape index: {}]   ;;  %s2610_s5 = inlined_call_operand.vmem [shape: f32[16,144], index: 5, kind: input, shape index: {}]   ;;  %s2611_s6 = inlined_call_operand.vmem [shape: f32[16,1], index: 6, kind: input, shape index: {}]   ;;  %s2612_s7 = inlined_call_operand.hbm [shape: f32[2,16,64], index: 7, kind: output, shape index: {}]  }
   0x1   :  { %2622 = sst [smem:[#allocation19_spill]] %s2605_s0 }
   0x2   :  { %2623 = sst [smem:[#allocation20_spill]] %s2607_s2 }
   0x3   :  { %12 = vsyncpa [#allocation6], 0 }
   0x4   :  { %14 = vsyncpa [#allocation6 + $0x1], 0 }
   0x5   :  { %15 = vsyncpa [#allocation9], 0 }
   0x6   :  { %17 = vsyncpa [#allocation9 + $0x1], 0 }
   0x7   :  { %18 = vsyncpa [#allocation7], 0 }
   0x8   :  { %20 = vsyncpa [#allocation7 + $0x1], 0  ;;  %s1951_s24 = smov 0   ;;  %s1953_s25 = smov 0  }
   0x9   :  { %s1955_s26 = smov 0   ;;  %s1957_s27 = smov 0  }
   0xa LB: > { %2624 = sst [smem:[#allocation16_spill]] %s1856_s26  ;;  %s1972_s28 = sadd.s32 4294967295, %s1860_s27   ;;  %s1860_s27 = sphi %s1957_s27, %s2646_s27   ;;  %s1856_s26 = sphi %s1955_s26, %s2648_s26   ;;  %s1852_s25 = sphi %s1953_s25, %s2650_s25   ;;  %s1848_s24 = sphi %s1951_s24, %s2649_s24  }
   0xb   : > { %s1418_s29 = sadd.s32 4294967294, %s1860_s27   ;;  %p46_p0 = scmp.ne.s32.totalorder %s1852_s25, %s1848_s24 }
   0xc   : > { %p2613_p1 = scmp.eq.s32.totalorder %s1972_s28, 0  ;;  %p207_p3 = scmp.eq.s32.totalorder %s1418_s29, 1 }
   0xd   : > { %p1419_p5 = scmp.ge.s32.totalorder %s1860_s27, 1  ;;  %p214_p7 = scmp.lt.s32.totalorder %s1860_s27, 3 }
   0xe   : > { %p1981_p4 = por %p2613_p1, %p46_p0  ;;  %p1986_p6 = por %p207_p3, %p46_p0 }
   0xf   : > { %p1991_p8 = pnand %p1419_p5, %p214_p7  ;;  %s1862_s10 = smov [#allocation10]  }
  0x10   : > { %s2625_s30 = scalar_select %p1981_p4, 1, 0 }
  0x11   : > { %s2626_s8 = scalar_select %p1986_p6, 1, 0 }
  0x12   : > { %s2627_s9 = scalar_select %p1991_p8, 1, 0 }
  0x13   : > { %s226_s11 = sshll.u32 %s1862_s10, 4  ;;  %p1556_p9 = pneg %p1991_p8  ;;  %s1995_s11 = int_to_ptr.vmem [resolvable:$true] %s226_s11 }
  0x14   : > { %s2007_s13 = sadd.s32 1, %s1860_s27   ;;  %s33_s14 = sadd.s32 1, %s1856_s26 }
  0x15   : > { %p2002_p11 = pnand %p1556_p9, %p2613_p1  ;;  %2629 = sst [smem:[#allocation17_spill]] %s2007_s13 }
  0x16   : > { %s30_s15 = ssub.s32 %s1860_s27, %s2007_s13  ;;  %s2630_s2 = sld [smem:[#allocation20_spill]] }
  0x17   : > { %p1700_p13 = pneg %p2002_p11 }
  0x1c   : > { %s1698_s18 = scalar_lea.hbm %s2630_s2, 256 }
  0x1d   : > { %p1699_p12 = scmp.ne.s32.totalorder %s2630_s2, %s1698_s18  ;;  %p1705_p5 = scmp.lt.u32.totalorder %s1698_s18, %s2630_s2 }
  0x1f   : > { %p1701_p0 = pnand %p1700_p13, %p1699_p12 }
  0x21   : > { %p1702_p3 = pneg %p1701_p0 }
  0x23   : > { %p1707_p7 = pnand %p1705_p5, %p1702_p3 }
  0x25   : > { %1710 = shalt.err (!%p1707_p7)
}
  0x26   : > { %s1711_s23 = scalar_lea.vmem %s1995_s11, 256  ;;  %p1719_p2 = scmp.lt.s32.totalorder %s1995_s11, %s1995_s11 }
  0x27   : > { %p1712_p9 = scmp.ne.s32.totalorder %s1995_s11, %s1711_s23  ;;  %p1720_p6 = scmp.lt.s32.totalorder %s1711_s23, %s1711_s23 }
  0x29   : > { %p1714_p10 = pnand %p1712_p9, %p1700_p13  ;;  %p1721_p4 = por %p1720_p6, %p1719_p2 }
  0x2b   : > { %p1715_p1 = pneg %p1714_p10 }
  0x2d   : > { %p1722_p8 = pnand %p1721_p4, %p1715_p1 }
  0x2f   : > { %1725 = shalt.err (!%p1722_p8)
}
  0x30   : > { %s2616_s29 = smov 128   ;;  %s2617_s10 = smov 8  }
  0x31   : > { %1559 = dma.hbm_to_vmem [thread:$0]  (!%p2002_p11), %s2630_s2, 256, %s1995_s11, [#allocation9], %s2616_s29, %s2616_s29, %s2617_s10  }
  0x32   : > { %p31_p1 = scmp.eq.s32.totalorder %s30_s15, 0  ;;  %p40_p2 = scmp.ne.s32.totalorder %s1856_s26, %s1852_s25 }
  0x33   : > { %p41_p4 = scmp.eq.s32.totalorder %s1860_s27, 0  ;;  %p1572_p6 = scmp.lt.s32.totalorder %s1860_s27, 2 }
  0x34   : > { %s2041_s18 = scalar_select %p31_p1, %s1856_s26, %s33_s14  }
  0x35   : > { %p42_p8 = por %p41_p4, %p40_p2  ;;  %p2632_p10 = scmp.eq.s32.totalorder %s1972_s28, 1 }
  0x36   : > { %2631 = sst [smem:[#allocation18_spill]] %s2041_s18  ;;  %s2050_s12 = sand.u32 1, %s1856_s26  }
  0x37   : > { %p2045_p12 = por %p2632_p10, %p40_p2  ;;  %s1454_s20 = sshll.u32 %s1860_s27, 10 }
  0x38   : > { %s1422_s21 = sshll.u32 %s2050_s12, 6  ;;  %s2634_s0 = sld [smem:[#allocation19_spill]] }
  0x39   : > { %s2633_s19 = scalar_select %p2045_p12, 1, 0 }
  0x3a   : > { %s256_s14 = scalar_lea.vmem [#allocation5], %s1422_s21  ;;  %p2059_p11 = pnand %p1572_p6, %p42_p8 }
  0x3b   : > { %s263_s23 = sshll.u32 %s256_s14, 4  ;;  %s253_s29 = scalar_lea.sflag [#allocation6], %s2050_s12  ;;  %s2063_s23 = int_to_ptr.vmem [resolvable:$true] %s263_s23 }
  0x3c   : > { %p1728_p0 = pneg %p2059_p11 }
  0x3e   : > { %s2057_s15 = scalar_lea.hbm %s2634_s0, %s1454_s20  ;;  %s1731_s11 = scalar_lea.hbm %s2634_s0, 2048 }
  0x3f   : > { %s1726_s10 = scalar_lea.hbm %s2057_s15, 1024  ;;  %p1732_p7 = scmp.lt.u32.totalorder %s2057_s15, %s2634_s0 }
  0x40   : > { %p1727_p13 = scmp.ne.s32.totalorder %s2057_s15, %s1726_s10  ;;  %p1733_p9 = scmp.lt.u32.totalorder %s1731_s11, %s1726_s10 }
  0x41   : > { %p1735_p2 = scmp.lt.u32.totalorder %s1726_s10, %s2057_s15 }
  0x42   : > { %p1729_p3 = pnand %p1728_p0, %p1727_p13  ;;  %p1734_p1 = por %p1733_p9, %p1732_p7 }
  0x44   : > { %p1730_p5 = pneg %p1729_p3  ;;  %p1736_p4 = por %p1735_p2, %p1734_p1 }
  0x46   : > { %p1737_p6 = pnand %p1736_p4, %p1730_p5 }
  0x48   : > { %1740 = shalt.err (!%p1737_p6)
}
  0x49   : > { %s1741_s17 = scalar_lea.vmem %s2063_s23, 1024  ;;  %s1865_s20 = smov [#allocation5]  }
  0x4a   : > { %p1742_p8 = scmp.ne.s32.totalorder %s2063_s23, %s1741_s17  ;;  %s1746_s21 = sshll.u32 %s1865_s20, 4  ;;  %s1747_s21 = int_to_ptr.vmem [resolvable:$false] %s1746_s21 }
  0x4b   : > { %s1748_s22 = scalar_lea.vmem %s1747_s21, 2048  ;;  %p1749_p3 = scmp.lt.s32.totalorder %s2063_s23, %s1747_s21 }
  0x4c   : > { %p1744_p10 = pnand %p1742_p8, %p1728_p0  ;;  %p1750_p7 = scmp.lt.s32.totalorder %s1748_s22, %s1741_s17 }
  0x4e   : > { %p1745_p13 = pneg %p1744_p10  ;;  %p1751_p9 = por %p1750_p7, %p1749_p3 }
  0x50   : > { %p1752_p1 = pnand %p1751_p9, %p1745_p13 }
  0x52   : > { %1755 = shalt.err (!%p1752_p1)
}
  0x53   : > { %s2636_s10 = smov 8   ;;  %s2637_s11 = smov 128  }
  0x54   : > { %1563 = dma.hbm_to_vmem [thread:$0]  (!%p2059_p11), %s2057_s15, 1024, %s2063_s23, %s253_s29, %s2637_s11, %s2637_s11, %s2636_s10  }
  0x55   : > { %s1425_s14 = sshll.u32 %s2050_s12, 3  ;;  %s1426_s20 = sshll.u32 %s1860_s27, 7 }
  0x56   : > { %s2102_s22 = scalar_lea.hbm %s2606_s1, %s1426_s20  ;;  %s277_s0 = scalar_lea.vmem [#allocation8], %s1425_s14 }
  0x57   : > { %s284_s2 = sshll.u32 %s277_s0, 4  ;;  %s2638_s18 = sand.u32 1, %s1860_s27   ;;  %s285_s2 = int_to_ptr.vmem [resolvable:$true] %s284_s2 }
  0x58   : > { %s274_s26 = scalar_lea.sflag [#allocation9], %s2638_s18  ;;  %s1756_s13 = scalar_lea.hbm %s2102_s22, 128 }
  0x59   : > { %p1757_p5 = scmp.ne.s32.totalorder %s2102_s22, %s1756_s13  ;;  %s1761_s15 = scalar_lea.hbm %s2606_s1, 256 }
  0x5a   : > { %p1762_p6 = scmp.lt.u32.totalorder %s2102_s22, %s2606_s1  ;;  %p1763_p8 = scmp.lt.u32.totalorder %s1761_s15, %s1756_s13 }
  0x5b   : > { %p1759_p2 = pnand %p1757_p5, %p1728_p0  ;;  %p1765_p13 = scmp.lt.u32.totalorder %s1756_s13, %s2102_s22 }
  0x5c   : > { %p1764_p10 = por %p1763_p8, %p1762_p6 }
  0x5d   : > { %p1760_p4 = pneg %p1759_p2 }
  0x5e   : > { %p1766_p3 = por %p1765_p13, %p1764_p10 }
  0x60   : > { %p1767_p7 = pnand %p1766_p3, %p1760_p4 }
  0x62   : > { %1770 = shalt.err (!%p1767_p7)
}
  0x63   : > { %s1771_s0 = scalar_lea.vmem %s285_s2, 128  ;;  %s1866_s18 = smov [#allocation8]  }
  0x64   : > { %p1772_p9 = scmp.ne.s32.totalorder %s285_s2, %s1771_s0  ;;  %s1776_s11 = sshll.u32 %s1866_s18, 4  ;;  %s1777_s11 = int_to_ptr.vmem [resolvable:$false] %s1776_s11 }
  0x65   : > { %s1778_s14 = scalar_lea.vmem %s1777_s11, 256  ;;  %p1779_p2 = scmp.lt.s32.totalorder %s285_s2, %s1777_s11 }
  0x66   : > { %p1774_p1 = pnand %p1772_p9, %p1728_p0  ;;  %p1780_p12 = scmp.lt.s32.totalorder %s1778_s14, %s1771_s0 }
  0x68   : > { %p1775_p5 = pneg %p1774_p1  ;;  %p1781_p6 = por %p1780_p12, %p1779_p2 }
  0x6a   : > { %p1782_p8 = pnand %p1781_p6, %p1775_p5 }
  0x6c   : > { %1785 = shalt.err (!%p1782_p8)
}
  0x6d   : > { %1566 = dma.hbm_to_vmem [thread:$0]  (!%p2059_p11), %s2102_s22, 128, %s285_s2, %s274_s26  }
  0x6e   : > { %p2639_p4 = scmp.ne.s32.totalorder %s2627_s9, 0 }
  0x6f   : > { %s2128_s13 = sand.u32 (!%p2639_p4), 1, %s1852_s25   ;;  %p2640_p12 = scmp.ne.s32.totalorder (!%p2639_p4), %s2625_s30, 0 }
  0x70   : > { %293 = sbr.rel (%p2639_p4) target bundleno = 1410 (0x582), region = 48  ;;  %s1428_s20 = sshll.u32 (!%p2639_p4), %s2128_s13, 6 }
  0x71   : > { %s296_s17 = scalar_lea.sflag (!%p2639_p4), [#allocation6], %s2128_s13  ;;  %s2132_s21 = scalar_lea.vmem (!%p2639_p4), [#allocation5], %s1428_s20 }
  0x77   : > { %1831 = dma.done.wait (%p2640_p12), %s296_s17, 1024  }
  0x78   : > { %1833 = vsyncadd (%p2640_p12), %s296_s17, 4294966272  ;;  %s304_s2 = sand.u32 1, %s1972_s28   ;;  %s1429_s26 = sshll.u32 %s2128_s13, 3 }
  0x79   : > { %s305_s9 = scalar_lea.sflag [#allocation9], %s304_s2  ;;  %s2140_s16 = scalar_lea.vmem [#allocation8], %s1429_s26 }
  0x7a   : > { %1835 = dma.done.wait (%p2640_p12), %s305_s9, 128  }
  0x7b   : > { %1837 = vsyncadd (%p2640_p12), %s305_s9, 4294967168  ;;  %p2641_p11 = scmp.eq.s32.totalorder %s1972_s28, 0 }
  0x7d   : > { %1839 = dma.done.wait (%p2641_p11), [#allocation9], 256   ;;  %p2642_p0 = pmov %p2641_p11 }
  0x7e   : > { %vm364_vm0 = vcmask 130048   ;;  %v362_v0 = vld [vmem:[#allocation10] sm:$0xff]  ;;  %v363_v1 = vld [vmem:[#allocation10 + $0x8] sm:$0xff]  ;;  %v354_v2 = vld [vmem:[%s2132_s21] sm:$0xff]  ;;  %vm499_vm1 = vcmask 1041409   ;;  %vm501_vm2 = vcmask 1045509  }
  0x7f   : > { %1841 = vsyncadd (%p2642_p0), [#allocation9], 4294967040  ;;  %v1501_v3 = vpack.c.bf16 %v363_v1, %v362_v0  ;;  %1476 = vmatprep.mubr.msk.f32.mxu0 %vm364_vm0, %v354_v2  ;;  %v355_v4 = vld [vmem:[%s2132_s21 + $0x8] sm:$0xff]  ;;  %v356_v5 = vld [vmem:[%s2132_s21 + $0x10] sm:$0xff]  ;;  %vm504_vm3 = vcmask 1042434   ;;  %vm506_vm4 = vcmask 1046534  }
  0x80   : > { %v357_v6 = vld [vmem:[%s2132_s21 + $0x18] sm:$0xff]  ;;  %v358_v7 = vld [vmem:[%s2132_s21 + $0x20] sm:$0xff]  ;;  %v359_v8 = vld [vmem:[%s2132_s21 + $0x28] sm:$0xff]  ;;  %vm509_vm5 = vcmask 1043459   ;;  %vm511_vm6 = vcmask 1047559   ;;  %s1867_s30 = smov 72  }
  0x81   : > { %1502 = vmatprep.subr.bf16.mxu0 %v1501_v3  ;;  %v360_v9 = vld [vmem:[%s2132_s21 + $0x30] sm:$0xff]  ;;  %v361_v10 = vld [vmem:[%s2132_s21 + $0x38] sm:$0xff]  ;;  %s1868_s22 = smov 34   ;;  %s1869_s29 = smov 52   ;;  %vm349_vm7 = vcmask 699392   ;;  %vm516_vm8 = vcmask 289936  }
  0x82   : > { %1504 = vmatpush3.bf16.msra.mxu0 %v1501_v3  ;;  %s1870_s12 = smov 18   ;;  %s1871_s15 = smov 54   ;;  %vm530_vm9 = vcmask 437536   ;;  %vm544_vm10 = vcmask 585136   ;;  %vm558_vm11 = vcmask 732736   ;;  %vm607_vm12 = vcmask 1044464  }
  0x83   : > { %s1872_s23 = smov 36   ;;  %s1873_s10 = smov 16   ;;  %vm608_vm13 = vcmask 130052   ;;  %vm576_vm14 = vcmask 880336   ;;  %vm604_vm15 = vcmask 1031168  }
  0x84   : > { %s1874_s0 = smov 126   ;;  %s1875_s18 = smov 90  }
  0x85   : > { %1477 = vmatmul.mubr.msk.f32.vlgmr.msra.gmra.mrb[0].mxu0 %vm364_vm0, %v355_v4  ;;  %s1876_s11 = smov 108   ;;  %s1877_s14 = smov 124  }
  0x86   : > { %1479 = vmatprep.mubr.msk.f32.mxu0 %vm364_vm0, %v356_v5  ;;  %s1878_s20 = smov 70   ;;  %s1880_s17 = smov 106  }
  0x87   : > { %s1881_s21 = smov 88   ;;  %s1882_s2 = smov 32  }
  0x88   : > { %s1883_s26 = smov 14   ;;  %s1884_s9 = smov 127  }
  0x89   : > { %1480 = vmatmul.mubr.msk.f32.gmra.mrb[2].mxu0 %vm364_vm0, %v357_v6  ;;  %p2643_p13 = scmp.ne.s32.totalorder %s2633_s19, 0 }
  0x8a   : > { %1482 = vmatprep.mubr.msk.f32.mxu0 %vm364_vm0, %v358_v7 }
  0x8d   : > { %1483 = vmatmul.mubr.msk.f32.gmra.mrb[4].mxu0 %vm364_vm0, %v359_v8 }
  0x8e   : > { %1485 = vmatprep.mubr.msk.f32.mxu0 %vm364_vm0, %v360_v9 }
  0x91   : > { %1486 = vmatmul.mubr.msk.f32.gmra.mrb[6].mxu0 %vm364_vm0, %v361_v10 }
 0x158   : > { %v2166_v11 = vpop.f32.mrb[0].mxu0 }
 0x159   : > { %v643_v12 = vrot.slane %v2166_v11, 1  ;;  %v2171_v13 = vcombine.high %v2166_v11, %v2166_v11  ;;  %v455_v14 = vpop.f32.mrb[1].mxu0  ;;  %v657_v15 = vrot.slane %v2166_v11, 2  ;;  %v671_v16 = vrot.slane %v2166_v11, 3 }
 0x15a   : > { %v518_v17 = vrot.slane %v455_v14, 1  ;;  %v2175_v18 = vcombine.high %v455_v14, %v455_v14  ;;  %v532_v21 = vrot.slane %v455_v14, 2  ;;  %v546_v22 = vrot.slane %v455_v14, 3 }
 0x15b   : > { %v703_v19 = vrot.slane %v2171_v13, 1  ;;  %v722_v20 = vrot.slane %v2171_v13, 2  ;;  %v736_v23 = vrot.slane %v2171_v13, 3 }
 0x15c   : > { %v578_v24 = vrot.slane %v2175_v18, 1  ;;  %v592_v25 = vrot.slane %v2175_v18, 2  ;;  %v611_v26 = vrot.slane %v2175_v18, 3  ;;  %v2183_v27 = vpop.f32.mrb[2].mxu0 }
 0x15d   : > { %v629_v28 = vrot.slane %v2183_v27, 7  ;;  %v644_v29 = vsel %vm499_vm1, %v2183_v27, %v643_v12  ;;  %v658_v30 = vrot.slane %v2183_v27, 1  ;;  %v672_v31 = vrot.slane %v2183_v27, 2  ;;  %v465_v32 = vpop.f32.mrb[3].mxu0 }
 0x15e   : > { %v2192_v33 = vcombine.high %v2183_v27, %v2183_v27  ;;  %v498_v34 = vrot.slane %v465_v32, 7  ;;  %v519_v35 = vsel %vm499_vm1, %v465_v32, %v518_v17  ;;  %v533_v36 = vrot.slane %v465_v32, 1 }
 0x15f   : > { %v547_v37 = vrot.slane %v465_v32, 2  ;;  %v2195_v38 = vcombine.high %v465_v32, %v465_v32  ;;  %v630_v39 = vsel %vm499_vm1, %v629_v28, %v2166_v11  ;;  %v645_v40 = vsel %vm501_vm2, %v2183_v27, %v644_v29 }
 0x160   : > { %v2201_v41 = vpop.f32.mrb[4].mxu0  ;;  %v631_v42 = vsel %vm501_vm2, %v629_v28, %v630_v39  ;;  %v500_v43 = vsel %vm499_vm1, %v498_v34, %v455_v14  ;;  %v534_v44 = vsel %vm499_vm1, %v533_v36, %v532_v21  ;;  %v520_v45 = vsel %vm501_vm2, %v465_v32, %v519_v35 }
 0x161   : > { %v2209_v46 = vcombine.high %v2201_v41, %v2201_v41  ;;  %v475_v47 = vpop.f32.mrb[5].mxu0  ;;  %v548_v48 = vsel %vm499_vm1, %v547_v37, %v546_v22  ;;  %v632_v49 = vrot.slane %v2201_v41, 6  ;;  %v646_v50 = vrot.slane %v2201_v41, 7 }
 0x162   : > { %v2214_v51 = vcombine.high %v475_v47, %v475_v47  ;;  %v549_v52 = vsel %vm501_vm2, %v547_v37, %v548_v48  ;;  %v550_v53 = vrot.slane %v475_v47, 1  ;;  %v502_v54 = vsel %vm501_vm2, %v498_v34, %v500_v43 }
 0x163   : > { %v633_v55 = vsel %vm504_vm3, %v632_v49, %v631_v42  ;;  %v647_v56 = vsel %vm504_vm3, %v646_v50, %v645_v40  ;;  %v503_v57 = vrot.slane %v475_v47, 6  ;;  %v535_v58 = vsel %vm501_vm2, %v533_v36, %v534_v44 }
 0x164   : > { %v2221_v59 = vpop.f32.mrb[6].mxu0  ;;  %v551_v60 = vsel %vm504_vm3, %v550_v53, %v549_v52  ;;  %v634_v61 = vsel %vm506_vm4, %v632_v49, %v633_v55  ;;  %v648_v62 = vsel %vm506_vm4, %v646_v50, %v647_v56  ;;  %v536_v63 = vsel %vm504_vm3, %v475_v47, %v535_v58 }
 0x165   : > { %v2229_v0 = vcombine.high %v2221_v59, %v2221_v59  ;;  %v485_v1 = vpop.f32.mrb[7].mxu0  ;;  %v552_v2 = vsel %vm506_vm4, %v550_v53, %v551_v60  ;;  %v635_v3 = vrot.slane %v2221_v59, 5  ;;  %v649_v4 = vrot.slane %v2221_v59, 6 }
 0x166   : > { %v2234_v5 = vcombine.high %v485_v1, %v485_v1  ;;  %v553_v6 = vsel %vm509_vm5, %v485_v1, %v552_v2  ;;  %v505_v7 = vsel %vm504_vm3, %v503_v57, %v502_v54  ;;  %v508_v8 = vrot.slane %v485_v1, 5 }
 0x167   : > { %v554_v9 = vsel %vm511_vm6, %v485_v1, %v553_v6  ;;  %v636_v10 = vsel %vm509_vm5, %v635_v3, %v634_v61  ;;  %v650_v12 = vsel %vm509_vm5, %v649_v4, %v648_v62  ;;  %v507_v14 = vsel %vm506_vm4, %v503_v57, %v505_v7 }
 0x168   : > { %555 = vrot.lane.b32.xlu1 %v554_v9, %s1867_s30  ;;  %v637_v17 = vsel %vm511_vm6, %v635_v3, %v636_v10  ;;  %v651_v21 = vsel %vm511_vm6, %v649_v4, %v650_v12  ;;  %v510_v22 = vsel %vm509_vm5, %v508_v8, %v507_v14  ;;  %v537_v28 = vsel %vm506_vm4, %v475_v47, %v536_v63  ;;  %s1885_s30 = smov 101  }
 0x169   : > { %638 = vrot.lane.b32.xlu0 %v637_v17, %s1868_s22  ;;  %v512_v29 = vsel %vm511_vm6, %v508_v8, %v510_v22  ;;  %v538_v32 = vrot.slane %v485_v1, 7  ;;  %v521_v34 = vrot.slane %v475_v47, 7  ;;  %v524_v35 = vrot.slane %v485_v1, 6  ;;  %s1886_s22 = smov 119  }
 0x16a   : > { %v612_v36 = vrot.slane %v2195_v38, 2  ;;  %v615_v37 = vrot.slane %v2214_v51, 1  ;;  %v593_v39 = vrot.slane %v2195_v38, 1  ;;  %v598_v40 = vrot.slane %v2234_v5, 7 }
 0x16b   : > { %v539_v42 = vsel %vm509_vm5, %v538_v32, %v537_v28  ;;  %v522_v43 = vsel %vm504_vm3, %v521_v34, %v520_v45  ;;  %v564_v44 = vrot.slane %v2195_v38, 7  ;;  %v567_v48 = vrot.slane %v2214_v51, 6 }
 0x16c   : > { %652 = vrot.lane.b32.xlu1 %v651_v21, %s1869_s29  ;;  %v540_v47 = vsel %vm511_vm6, %v538_v32, %v539_v42  ;;  %v523_v49 = vsel %vm506_vm4, %v521_v34, %v522_v43  ;;  %v613_v50 = vsel %vm499_vm1, %v612_v36, %v611_v26  ;;  %v594_v52 = vsel %vm499_vm1, %v593_v39, %v592_v25  ;;  %s1887_s29 = smov 92  }
 0x16d   : > { %513 = vrot.lane.b32.xlu0 %v512_v29, %s1870_s12  ;;  %v525_v45 = vsel %vm509_vm5, %v524_v35, %v523_v49  ;;  %v614_v53 = vsel %vm501_vm2, %v612_v36, %v613_v50  ;;  %v595_v54 = vsel %vm501_vm2, %v593_v39, %v594_v52  ;;  %v565_v55 = vsel %vm499_vm1, %v564_v44, %v2175_v18 }
 0x16e   : > { %v526_v56 = vsel %vm511_vm6, %v524_v35, %v525_v45  ;;  %v616_v26 = vsel %vm504_vm3, %v615_v37, %v614_v53  ;;  %v596_v57 = vsel %vm504_vm3, %v2214_v51, %v595_v54  ;;  %v566_v25 = vsel %vm501_vm2, %v564_v44, %v565_v55 }
 0x16f   : > { %v617_v58 = vsel %vm506_vm4, %v615_v37, %v616_v26  ;;  %v597_v60 = vsel %vm506_vm4, %v2214_v51, %v596_v57  ;;  %v568_v61 = vsel %vm504_vm3, %v567_v48, %v566_v25  ;;  %v570_v62 = vrot.slane %v2234_v5, 5 }
 0x170   : > { %541 = vrot.lane.b32.xlu1 %v540_v47, %s1871_s15  ;;  %v618_v63 = vsel %vm509_vm5, %v2234_v5, %v617_v58  ;;  %v599_v1 = vsel %vm509_vm5, %v598_v40, %v597_v60  ;;  %v569_v2 = vsel %vm506_vm4, %v567_v48, %v568_v61  ;;  %v579_v3 = vsel %vm499_vm1, %v2195_v38, %v578_v24  ;;  %s1888_s15 = smov 110  }
 0x171   : > { %527 = vrot.lane.b32.xlu0 %v526_v56, %s1872_s23  ;;  %v619_v4 = vsel %vm511_vm6, %v2234_v5, %v618_v63  ;;  %v600_v6 = vsel %vm511_vm6, %v598_v40, %v599_v1  ;;  %v571_v7 = vsel %vm509_vm5, %v570_v62, %v569_v2  ;;  %v580_v8 = vsel %vm501_vm2, %v2195_v38, %v579_v3  ;;  %s1889_s23 = smov 109  }
 0x172   : > { %v572_v9 = vsel %vm511_vm6, %v570_v62, %v571_v7  ;;  %v581_v10 = vrot.slane %v2214_v51, 7  ;;  %v584_v18 = vrot.slane %v2234_v5, 6  ;;  %v704_v24 = vsel %vm499_vm1, %v2192_v33, %v703_v19 }
 0x173   : > { %v705_v12 = vsel %vm501_vm2, %v2192_v33, %v704_v24  ;;  %v706_v14 = vrot.slane %v2209_v46, 7  ;;  %v709_v17 = vrot.slane %v2229_v0, 6  ;;  %v659_v38 = vsel %vm499_vm1, %v658_v30, %v657_v15 }
 0x174   : > { %620 = vrot.lane.b32.xlu1 %v619_v4, %s1873_s10  ;;  %v582_v51 = vsel %vm504_vm3, %v581_v10, %v580_v8  ;;  %v660_v19 = vsel %vm501_vm2, %v658_v30, %v659_v38  ;;  %v663_v5 = vrot.slane %v2221_v59, 7  ;;  %v689_v21 = vrot.slane %v2192_v33, 7 }
 0x175   : > { %601 = vrot.lane.b32.xlu0 %v600_v6, %s1874_s0  ;;  %v583_v22 = vsel %vm506_vm4, %v581_v10, %v582_v51  ;;  %v707_v15 = vsel %vm504_vm3, %v706_v14, %v705_v12  ;;  %v661_v28 = vsel %vm504_vm3, %v2201_v41, %v660_v19  ;;  %v692_v29 = vrot.slane %v2209_v46, 6 }
 0x176   : > { %v585_v32 = vsel %vm509_vm5, %v584_v18, %v583_v22  ;;  %v708_v30 = vsel %vm506_vm4, %v706_v14, %v707_v15  ;;  %v662_v34 = vsel %vm506_vm4, %v2201_v41, %v661_v28  ;;  %v690_v35 = vsel %vm499_vm1, %v689_v21, %v2171_v13 }
 0x177   : > { %v586_v36 = vsel %vm511_vm6, %v584_v18, %v585_v32  ;;  %v710_v37 = vsel %vm509_vm5, %v709_v17, %v708_v30  ;;  %v664_v39 = vsel %vm509_vm5, %v663_v5, %v662_v34  ;;  %v691_v40 = vsel %vm501_vm2, %v689_v21, %v690_v35  ;;  %v865_v35 = vld [vmem:[%s2609_s4] sm:$0xff] }
 0x178   : > { %573 = vrot.lane.b32.xlu1 %v572_v9, %s1875_s18  ;;  %v711_v42 = vsel %vm511_vm6, %v709_v17, %v710_v37  ;;  %v665_v43 = vsel %vm511_vm6, %v663_v5, %v664_v39  ;;  %v693_v44 = vsel %vm504_vm3, %v692_v29, %v691_v40  ;;  %v695_v48 = vrot.slane %v2229_v0, 5  ;;  %s1890_s18 = smov 83  }
 0x179   : > { %587 = vrot.lane.b32.xlu0 %v586_v36, %s1876_s11  ;;  %v694_v47 = vsel %vm506_vm4, %v692_v29, %v693_v44  ;;  %v673_v49 = vsel %vm499_vm1, %v672_v31, %v671_v16  ;;  %v675_v50 = vrot.slane %v2201_v41, 1  ;;  %v737_v52 = vrot.slane %v2192_v33, 2  ;;  %s1892_s11 = smov 91   ;;  %v1075_v36 = vld [vmem:[%s2140_s16] sm:$0xff]  ;;  %s1908_s16 = smov 111  }
 0x17a   : > { %v696_v45 = vsel %vm509_vm5, %v695_v48, %v694_v47  ;;  %v674_v53 = vsel %vm501_vm2, %v672_v31, %v673_v49  ;;  %v740_v54 = vrot.slane %v2209_v46, 1  ;;  %v723_v55 = vrot.slane %v2192_v33, 1 }
 0x17b   : > { %v697_v11 = vsel %vm511_vm6, %v695_v48, %v696_v45  ;;  %v676_v56 = vsel %vm504_vm3, %v675_v50, %v674_v53  ;;  %v738_v16 = vsel %vm499_vm1, %v737_v52, %v736_v23  ;;  %v728_v41 = vrot.slane %v2229_v0, 7 }
 0x17c   : > { %712 = vrot.lane.b32.xlu1 %v711_v42, %s1877_s14  ;;  %v677_v27 = vsel %vm506_vm4, %v675_v50, %v676_v56  ;;  %v739_v31 = vsel %vm501_vm2, %v737_v52, %v738_v16  ;;  %v724_v33 = vsel %vm499_vm1, %v723_v55, %v722_v20  ;;  %v1879_v25 = vmov 0.0   ;;  %s1904_s14 = smov 8  }
 0x17d   : > { %666 = vrot.lane.b32.xlu0 %v665_v43, %s1878_s20  ;;  %v678_v26 = vsel %vm509_vm5, %v2221_v59, %v677_v27  ;;  %v741_v57 = vsel %vm504_vm3, %v740_v54, %v739_v31  ;;  %v725_v23 = vsel %vm501_vm2, %v723_v55, %v724_v33  ;;  %348 = vst [vmem:[#allocation2] sm:$0xff] %v1879_v25  ;;  %350 = vst.msk [vmem:[#allocation2 + $0x8] sm:$0xf] %vm349_vm7, %v1879_v25  ;;  %vm590_vm1 = vcmask 1027936   ;;  %s1906_s20 = smov 118  }
 0x17e   : > { %945 = vmatprep.mubr.f32.mxu0 %v1879_v25  ;;  %v679_v58 = vsel %vm511_vm6, %v2221_v59, %v678_v26  ;;  %v742_v13 = vsel %vm506_vm4, %v740_v54, %v741_v57  ;;  %v726_v20 = vsel %vm504_vm3, %v2209_v46, %v725_v23  ;;  %vm609_vm2 = vmor %vm608_vm13, %vm607_vm12  ;;  %vm623_vm3 = vcmask 273536  }
 0x17f   : > { %v743_v60 = vsel %vm509_vm5, %v2229_v0, %v742_v13  ;;  %v727_v61 = vsel %vm506_vm4, %v2209_v46, %v726_v20  ;;  %vm641_vm4 = vcmask 421136   ;;  %vm718_vm7 = vcmask 1044448  }
 0x180   : > { %698 = vrot.lane.b32.xlu1 %v697_v11, %s1880_s17  ;;  %v744_v62 = vsel %vm511_vm6, %v2229_v0, %v743_v60  ;;  %v729_v63 = vsel %vm509_vm5, %v728_v41, %v727_v61  ;;  %vm655_vm5 = vcmask 568736   ;;  %vm734_vm13 = vcmask 257136   ;;  %s1894_s17 = smov 9  }
 0x181   : > { %680 = vrot.lane.b32.xlu0 %v679_v58, %s1881_s21  ;;  %v730_v59 = vsel %vm511_vm6, %v728_v41, %v729_v63  ;;  %vm669_vm6 = vcmask 716336   ;;  %v1891_v34 = vmov 0.0|0.0   ;;  %v1082_v37 = vlaneseq  ;;  %s1896_s21 = smov 53  }
 0x182   : > { %1519 = vmatprep.subr.bf16.mxu1 %v1891_v34  ;;  %v1893_v39 = vmov 0  }
 0x183   : > { %1688 = vset.pattern.permute.xlu1 %v1893_v39  ;;  %v2416_v40 = vand.u32 127, %v1082_v37  ;;  %1694 = vset.pattern.permute.xlu0 %v1893_v39 }
 0x184   : > { %745 = vrot.lane.b32.xlu1 %v744_v62, %s1882_s2  ;;  %s1897_s2 = smov 81  }
 0x185   : > { %731 = vrot.lane.b32.xlu0 %v730_v59, %s1883_s26  ;;  %v1088_v42 = vand.u32 7, %v2416_v40  ;;  %s1898_s26 = smov 125  }
 0x1da   : > { %v556_v1 = vpop.permute.xlu1 %555 }
 0x1db   : > { %v639_v46 = vpop.permute.xlu0 %638 }
 0x1de   : > { %v653_v2 = vpop.permute.xlu1 %652 }
 0x1df   : > { %v514_v3 = vpop.permute.xlu0 %513 }
 0x1e0   : > { %517 = vst.msk [vmem:[#allocation2] sm:$0xf] %vm516_vm8, %v514_v3  ;;  %vm719_vm8 = vcmask 113668  }
 0x1e1   : > { %vm720_vm12 = vmor %vm719_vm8, %vm718_vm7  ;;  %vm824_vm7 = vcmask 752640   ;;  %vm836_vm8 = vcmask 678912  }
 0x1e2   : > { %v542_v0 = vpop.permute.xlu1 %541 }
 0x1e3   : > { %v528_v4 = vpop.permute.xlu0 %527 }
 0x1e4   : > { %531 = vst.msk [vmem:[#allocation2] sm:$0xf] %vm530_vm9, %v528_v4  ;;  %vm683_vm9 = vcmask 863936  }
 0x1e5   : > { %545 = vst.msk [vmem:[#allocation2] sm:$0xf] %vm544_vm10, %v542_v0  ;;  %vm715_vm10 = vcmask 1014784  }
 0x1e6   : > { %v621_v6 = vpop.permute.xlu1 %620  ;;  %559 = vst.msk [vmem:[#allocation2] sm:$0xf] %vm558_vm11, %v556_v1  ;;  %vm701_vm11 = vcmask 1011536  }
 0x1e7   : > { %v602_v7 = vpop.permute.xlu0 %601 }
 0x1e8   : > { %v603_v8 = vrot.slane %v602_v7, 4 }
 0x1ea   : > { %v574_v9 = vpop.permute.xlu1 %573  ;;  %v605_v18 = vsel %vm604_vm15, %v603_v8, %v602_v7  ;;  %vm1099_vm15 = vcmp.ne.s32.totalorder %v1088_v42, 7 }
 0x1eb   : > { %577 = vst.msk [vmem:[#allocation2] sm:$0xf] %vm576_vm14, %v574_v9  ;;  %v588_v10 = vpop.permute.xlu0 %587  ;;  %vm748_vm14 = vcmask 404736   ;;  %v2422_v43 = vsel %vm1099_vm15, 1.0, %v1879_v25  ;;  %vm1032_vm15 = vcmask 138312  }
 0x1ec   : > { %591 = vst.msk [vmem:[#allocation2] sm:$0xf] %vm590_vm1, %v588_v10  ;;  %vm764_vm1 = vcmask 973824  }
 0x1ed   : > { %610 = vst.msk [vmem:[#allocation2] sm:$0xff] %vm609_vm2, %v605_v18  ;;  %vm776_vm2 = vcmask 1039360  }
 0x1ee   : > { %624 = vst.msk [vmem:[#allocation2 + $0x4] sm:$0xf] %vm623_vm3, %v621_v6  ;;  %v713_v24 = vpop.permute.xlu1 %712  ;;  %vm800_vm3 = vcmask 826368  }
 0x1ef   : > { %v667_v12 = vpop.permute.xlu0 %666  ;;  %642 = vst.msk [vmem:[#allocation2 + $0x4] sm:$0xf] %vm641_vm4, %v639_v46  ;;  %v714_v14 = vrot.slane %v713_v24, 4  ;;  %vm851_vm4 = vcmask 1043456  }
 0x1f0   : > { %656 = vst.msk [vmem:[#allocation2 + $0x4] sm:$0xf] %vm655_vm5, %v653_v2  ;;  %vm788_vm5 = vcmask 900096  }
 0x1f1   : > { %670 = vst.msk [vmem:[#allocation2 + $0x4] sm:$0xf] %vm669_vm6, %v667_v12  ;;  %v716_v51 = vsel %vm715_vm10, %v714_v14, %v713_v24  ;;  %vm812_vm6 = vcmask 891904   ;;  %vm871_vm10 = vcmask 293888  }
 0x1f2   : > { %v699_v17 = vpop.permute.xlu1 %698 }
 0x1f3   : > { %v681_v38 = vpop.permute.xlu0 %680 }
 0x1f4   : > { %684 = vst.msk [vmem:[#allocation2 + $0x4] sm:$0xf] %vm683_vm9, %v681_v38  ;;  %vm848_vm9 = vcmask 744448  }
 0x1f5   : > { %702 = vst.msk [vmem:[#allocation2 + $0x4] sm:$0xf] %vm701_vm11, %v699_v17  ;;  %vm1895_vm11 = vmmov 0  }
 0x1f6   : > { %721 = vst.msk [vmem:[#allocation2 + $0x4] sm:$0xff] %vm720_vm12, %v716_v51  ;;  %v746_v5 = vpop.permute.xlu1 %745  ;;  %vm351_vm12 = vcmask 785408  }
 0x1f7   : > { %v732_v19 = vpop.permute.xlu0 %731  ;;  %353 = vst.msk [vmem:[#allocation4] sm:$0xff] %vm351_vm12, %v1879_v25  ;;  %352 = vst.msk [vmem:[#allocation3] sm:$0xff] %vm351_vm12, %v1879_v25 }
 0x1f8   : > { %735 = vst.msk [vmem:[#allocation2 + $0x8] sm:$0xf] %vm734_vm13, %v732_v19  ;;  %vm1080_vm13 = vcmask 597064  }
 0x1f9   : > { %749 = vst.msk [vmem:[#allocation2 + $0x8] sm:$0xf] %vm748_vm14, %v746_v5  ;;  %vm1096_vm14 = vcmp.ne.s32.totalorder %v1088_v42, 0 }
 0x1fd   : > { %v2381_v21 = vld [vmem:[#allocation2] sm:$0xff] }
 0x1fe   : > { %770 = vrot.lane.b32.xlu0 %v2381_v21, %s1884_s9  ;;  %v2387_v22 = vcombine.high %v2381_v21, %v2381_v21  ;;  %v756_v29 = vcombine.low %v2381_v21, %v2381_v21 }
 0x200   : > { %v2389_v15 = vld [vmem:[#allocation2 + $0x8] sm:$0xf] }
 0x201   : > { %v1653_v28 = vpack.i.bf16 %v2389_v15, %v2387_v22  ;;  %v757_v32 = vcombine.low %v2389_v15, %v2389_v15 }
 0x202   : > { %794 = vrot.lane.b32.xlu0 %v2381_v21, %s1885_s30 }
 0x203   : > { %1654 = vrot.lane.b32.xlu1 %v1653_v28, %s1884_s9  ;;  %v1668_v30 = vpack.i.bf16 %v757_v32, %v2381_v21 }
 0x206   : > { %1659 = vrot.lane.b32.xlu0 %v1653_v28, %s1885_s30  ;;  %s1899_s30 = smov 25  }
 0x207   : > { %758 = vrot.lane.b32.xlu1 %v756_v29, %s1886_s22 }
 0x20a   : > { %1664 = vrot.lane.b32.xlu0 %v1653_v28, %s1887_s29 }
 0x20b   : > { %782 = vrot.lane.b32.xlu1 %v756_v29, %s1888_s15 }
 0x20e   : > { %1669 = vrot.lane.b32.xlu0 %v1668_v30, %s1886_s22 }
 0x20f   : > { %806 = vrot.lane.b32.xlu1 %v756_v29, %s1889_s23 }
 0x212   : > { %1674 = vrot.lane.b32.xlu0 %v1668_v30, %s1888_s15 }
 0x213   : > { %1679 = vrot.lane.b32.xlu1 %v1668_v30, %s1889_s23 }
 0x216   : > { %818 = vrot.lane.b32.xlu0 %v2381_v21, %s1887_s29  ;;  %s1900_s29 = smov 69  }
 0x217   : > { %1684 = vrot.lane.b32.xlu1 %v1668_v30, %s1890_s18 }
 0x21a   : > { %844 = vrot.lane.b32.xlu0 %v2387_v22, %s1892_s11 }
 0x21b   : > { %830 = vrot.lane.b32.xlu1 %v756_v29, %s1890_s18  ;;  %s1901_s18 = smov 97  }
 0x21e   : > { %842 = vrot.lane.b32.xlu0 %v2381_v21, %s1892_s11 }
 0x21f   : > { %846 = vrot.lane.b32.xlu1 %v2389_v15, %s1892_s11  ;;  %s1903_s11 = smov 10  }
 0x222   : > { %1077 = vrot.lane.b32.xlu0 %v1075_v36, %s1894_s17 }
 0x223   : > { %868 = vperm.xlu1 %1688, %v865_v35  }
 0x227   : > { %1122 = vrot.lane.b32.xlu1 %v2422_v43, %s1870_s12 }
 0x270   : > { %v771_v44 = vpop.permute.xlu0 %770 }
 0x274   : > { %v795_v48 = vpop.permute.xlu0 %794 }
 0x275   : > { %v2426_v47 = vpop.permute.xlu1 %1654 }
 0x276   : > { %v1656_v56 = vunpack.i.l.bf16 %v2426_v47  ;;  %v1657_v16 = vunpack.i.h.bf16 %v2426_v47 }
 0x278   : > { %v2428_v49 = vpop.permute.xlu0 %1659  ;;  %v777_v57 = vsel %vm776_vm2, %v771_v44, %v1656_v56  ;;  %v778_v20 = vsel %vm776_vm2, %v1656_v56, %v1657_v16  ;;  %vm1042_vm2 = vcmask 269512  }
 0x279   : > { %v759_v50 = vpop.permute.xlu1 %758  ;;  %v1662_v60 = vunpack.i.h.bf16 %v2428_v49  ;;  %v1661_v63 = vunpack.i.l.bf16 %v2428_v49 }
 0x27b   : > { %v802_v24 = vsel %vm800_vm3, %v1661_v63, %v1662_v60 }
 0x27c   : > { %v2430_v52 = vpop.permute.xlu0 %1664 }
 0x27d   : > { %v783_v45 = vpop.permute.xlu1 %782  ;;  %v1667_v59 = vunpack.i.h.bf16 %v2430_v52  ;;  %v1666_v1 = vunpack.i.l.bf16 %v2430_v52 }
 0x27f   : > { %v826_v14 = vsel %vm824_vm7, %v1666_v1, %v1667_v59 }
 0x280   : > { %v2432_v53 = vpop.permute.xlu0 %1669 }
 0x281   : > { %v1672_v54 = vunpack.i.h.bf16 %v2432_v53  ;;  %v1671_v55 = vunpack.i.l.bf16 %v2432_v53  ;;  %v807_v11 = vpop.permute.xlu1 %806 }
 0x283   : > { %v766_v27 = vsel %vm764_vm1, %v1671_v55, %v1672_v54  ;;  %v765_v23 = vsel %vm764_vm1, %v759_v50, %v1671_v55  ;;  %v854_v47 = vsel %vm851_vm4, %v2389_v15, %v1672_v54  ;;  %vm1037_vm1 = vcmask 203912  }
 0x284   : > { %v1675_v41 = vpop.permute.xlu0 %1674  ;;  %v853_v2 = vsel %vm851_vm4, %v2387_v22, %v766_v27  ;;  %v852_v6 = vsel %vm851_vm4, %v2381_v21, %v765_v23  ;;  %v801_v21 = vsel %vm800_vm3, %v795_v48, %v1661_v63  ;;  %v864_v48 = vld [vmem:[%s2608_s3] sm:$0xff]  ;;  %vm1047_vm3 = vcmask 335112  }
 0x285   : > { %v1677_v31 = vunpack.i.h.bf16 %v1675_v41  ;;  %v1676_v33 = vunpack.i.l.bf16 %v1675_v41  ;;  %v2440_v26 = vpop.permute.xlu1 %1679 }
 0x286   : > { %v1682_v58 = vunpack.i.h.bf16 %v2440_v26  ;;  %v1681_v13 = vunpack.i.l.bf16 %v2440_v26 }
 0x287   : > { %v789_v61 = vsel %vm788_vm5, %v783_v45, %v1676_v33  ;;  %v790_v62 = vsel %vm788_vm5, %v1676_v33, %v1677_v31  ;;  %v857_v44 = vsel %vm851_vm4, %v1657_v16, %v1677_v31  ;;  %vm1058_vm5 = vcmask 466312  }
 0x288   : > { %v819_v46 = vpop.permute.xlu0 %818  ;;  %v814_v3 = vsel %vm812_vm6, %v1681_v13, %v1682_v58  ;;  %v856_v4 = vsel %vm851_vm4, %v778_v20, %v790_v62  ;;  %v855_v7 = vsel %vm851_vm4, %v777_v57, %v789_v61  ;;  %v813_v12 = vsel %vm812_vm6, %v807_v11, %v1681_v13 }
 0x289   : > { %v1685_v0 = vpop.permute.xlu1 %1684  ;;  %v1505_v10 = vpack.c.bf16 %v856_v4, %v853_v2  ;;  %v1507_v18 = vpack.c.bf16 %v855_v7, %v852_v6  ;;  %v859_v19 = vsel %vm851_vm4, %v802_v24, %v814_v3  ;;  %v825_v22 = vsel %vm824_vm7, %v819_v46, %v1666_v1 }
 0x28a   : > { %v1687_v8 = vunpack.i.h.bf16 %v1685_v0  ;;  %v1686_v9 = vunpack.i.l.bf16 %v1685_v0  ;;  %v858_v32 = vsel %vm851_vm4, %v801_v21, %v813_v12  ;;  %v1514_v50 = vpack.c.bf16 %v857_v44, %v854_v47 }
 0x28b   : > { %1506 = vmatprep.subr.bf16.mxu0 %v1505_v10  ;;  %v860_v45 = vsel %vm851_vm4, %v1662_v60, %v1682_v58  ;;  %v2497_v20 = vsel %vm1096_vm14, 1.0, %v1879_v25  ;;  %vm1063_vm6 = vcmask 531912   ;;  %vm1070_vm7 = vcmask 564224  }
 0x28c   : > { %v845_v17 = vpop.permute.xlu0 %844  ;;  %v838_v38 = vsel %vm836_vm8, %v1686_v9, %v1687_v8  ;;  %1508 = vmatpush1.bf16.msra.mxu0 %v1507_v18  ;;  %v863_v52 = vsel %vm851_vm4, %v1667_v59, %v1687_v8 }
 0x28d   : > { %v831_v51 = vpop.permute.xlu1 %830  ;;  %v862_v5 = vsel %vm851_vm4, %v826_v14, %v838_v38  ;;  %v1517_v53 = vpack.c.bf16 %v863_v52, %v860_v45  ;;  %v1196_v38 = vld [vmem:[%s2610_s5 + $0x8] sm:$0xff] }
 0x28e   : > { %v837_v28 = vsel %vm836_vm8, %v831_v51, %v1686_v9  ;;  %v1509_v29 = vpack.c.bf16 %v862_v5, %v859_v19  ;;  %vm1073_vm8 = vcmask 597512   ;;  %1447 = vmatprep.mubr.msk.f32.mxu1 %vm364_vm0, %v1196_v38 }
 0x28f   : > { %v861_v30 = vsel %vm851_vm4, %v825_v22, %v837_v28  ;;  %v1199_v22 = vld [vmem:[%s2611_s6] sm:$0xff]  ;;  %v1200_v28 = vld [vmem:[%s2611_s6 + $0x8] sm:$0xff] }
 0x290   : > { %v1511_v35 = vpack.c.bf16 %v861_v30, %v858_v32  ;;  %1510 = vmatprep.subr.bf16.mxu0 %v1509_v29  ;;  %v843_v37 = vpop.permute.xlu0 %842 }
 0x291   : > { %v847_v36 = vpop.permute.xlu1 %846  ;;  %v849_v49 = vsel %vm848_vm9, %v843_v37, %v845_v17 }
 0x292   : > { %v850_v39 = vsel %vm848_vm9, %v845_v17, %v847_v36  ;;  %1512 = vmatpush1.bf16.msra.mxu0 %v1511_v35  ;;  %vm1296_vm9 = vcmask 523264  }
 0x293   : > { %1440 = vmatprep.subr.msk.mxu0 %vm851_vm4, %v850_v39 }
 0x294   : > { %v1078_v15 = vpop.permute.xlu0 %1077 }
 0x295   : > { %1081 = vst.msk [vmem:[#allocation4] sm:$0xff] %vm1080_vm13, %v1078_v15 }
 0x296   : > { %1441 = vmatpush1.msk.msra.mxu0 %vm851_vm4, %v849_v49 }
 0x297   : > { %1442 = vmatmul.mubr.msk.f32.vlgmr.msra.gmra.mrb[8].mxu0 %vm871_vm10, %v864_v48  ;;  %1513 = vmatprep.subr.bf16.mxu0 %v1891_v34 }
 0x298   : > { %1515 = vmatpush3.bf16.msra.mxu0 %v1514_v50  ;;  %1498 = vmatprep.mubr.msk.f32.mxu0 %vm1895_vm11, %v1879_v25 }
 0x299   : > { %1516 = vmatprep.subr.bf16.mxu0 %v1891_v34 }
 0x29c   : > { %1518 = vmatpush3.bf16.msra.mxu0 %v1517_v53  ;;  %v2499_v61 = vld [vmem:[#allocation4] sm:$0xff] }
 0x29d   : > { %1496 = vmatprep.subr.mxu0 %v1879_v25  ;;  %v1127_v45 = vmul.f32 %v2497_v20, %v2499_v61 }
 0x2a0   : > { %1497 = vmatpush3.msk.msra.mxu0 %vm851_vm4, %v847_v36  ;;  %vm1053_vm4 = vcmask 400712  }
 0x2a1   : > { %1499 = vmatmul.mubr.msk.f32.vlgmr.msra.gmra.mrb[10].mxu0 %vm871_vm10, %v864_v48 }
 0x2a2   : > { %v869_v54 = vpop.permute.xlu1 %868 }
 0x2a6   : > { %v1123_v60 = vpop.permute.xlu1 %1122 }
 0x2a7   : > { %v1132_v40 = vmul.f32 %v2499_v61, %v1123_v60 }
 0x36a   : > { %v947_v55 = vpop.f32.mrb[8].mxu0 }
 0x36b   : > { %v948_v11 = vadd.f32 %v947_v55, %v869_v54  ;;  %v949_v56 = vpop.f32.mrb[9].mxu0 }
 0x36c   : > { %v950_v27 = vadd.f32 %v949_v56, %v869_v54 }
 0x36d   : > { %v1022_v16 = vmul.f32 0.01, %v948_v11 }
 0x36e   : > { %v1023_v31 = vmul.f32 0.01, %v950_v27 }
 0x36f   : > { %v1025_v41 = vmax.f32 %v948_v11, %v1022_v16 }
 0x370   : > { %v1026_v57 = vmax.f32 %v950_v27, %v1023_v31 }
 0x371   : > { %1034 = vrot.lane.b32.xlu1 %v1025_v41, %s1889_s23  ;;  %1029 = vrot.lane.b32.xlu0 %v1025_v41, %s1894_s17  ;;  %s1902_s23 = smov 2   ;;  %s1907_s17 = smov 112  }
 0x374   : > { %v1018_v33 = vpop.f32.mrb[10].mxu0 }
 0x375   : > { %1044 = vrot.lane.b32.xlu1 %v1025_v41, %s1896_s21  ;;  %1039 = vrot.lane.b32.xlu0 %v1025_v41, %s1897_s2  ;;  %v1500_v26 = vpop.f32.mrb[11].mxu0  ;;  %v1019_v23 = vadd.f32 %v1018_v33, %v869_v54 }
 0x377   : > { %v1024_v58 = vmul.f32 0.01, %v1019_v23 }
 0x379   : > { %1055 = vrot.lane.b32.xlu1 %v1026_v57, %s1898_s26  ;;  %1050 = vrot.lane.b32.xlu0 %v1026_v57, %s1899_s30  ;;  %v1027_v13 = vmax.f32 %v1019_v23, %v1024_v58  ;;  %v1195_v58 = vld [vmem:[%s2610_s5] sm:$0xff] }
 0x37d   : > { %1066 = vrot.lane.b32.xlu1 %v1026_v57, %s1900_s29  ;;  %1060 = vrot.lane.b32.xlu0 %v1026_v57, %s1901_s18 }
 0x381   : > { %1105 = vrot.lane.b32.xlu1 %v2422_v43, %s1902_s23  ;;  %1068 = vrot.lane.b32.xlu0 %v1027_v13, %s1900_s29  ;;  %v1198_v13 = vld [vmem:[%s2610_s5 + $0x18] sm:$0xff] }
 0x385   : > { %1114 = vrot.lane.b32.xlu1 %v2422_v43, %s1903_s11  ;;  %1110 = vrot.lane.b32.xlu0 %v2497_v20, %s1904_s14  ;;  %s1431_s11 = sshll.u32 %s2128_s13, 4 }
 0x389   : > { %1187 = vrot.lane.b32.xlu1 %v1132_v40, %s1884_s9  ;;  %1118 = vrot.lane.b32.xlu0 %v2497_v20, %s1873_s10  ;;  %s1905_s10 = smov 120  }
 0x3e3   : > { %v1035_v25 = vpop.permute.xlu1 %1034  ;;  %v1030_v42 = vpop.permute.xlu0 %1029 }
 0x3e4   : > { %1033 = vst.msk [vmem:[#allocation3] sm:$0xff] %vm1032_vm15, %v1030_v42 }
 0x3e5   : > { %1038 = vst.msk [vmem:[#allocation3] sm:$0xff] %vm1037_vm1, %v1035_v25 }
 0x3e7   : > { %v1045_v43 = vpop.permute.xlu1 %1044  ;;  %v1040_v62 = vpop.permute.xlu0 %1039 }
 0x3e8   : > { %1043 = vst.msk [vmem:[#allocation3] sm:$0xff] %vm1042_vm2, %v1040_v62 }
 0x3e9   : > { %1048 = vst.msk [vmem:[#allocation3] sm:$0xff] %vm1047_vm3, %v1045_v43 }
 0x3eb   : > { %v1056_v63 = vpop.permute.xlu1 %1055  ;;  %v1051_v59 = vpop.permute.xlu0 %1050 }
 0x3ec   : > { %1054 = vst.msk [vmem:[#allocation3] sm:$0xff] %vm1053_vm4, %v1051_v59 }
 0x3ed   : > { %1059 = vst.msk [vmem:[#allocation3] sm:$0xff] %vm1058_vm5, %v1056_v63 }
 0x3ef   : > { %v1061_v1 = vpop.permute.xlu0 %1060  ;;  %v1067_v46 = vpop.permute.xlu1 %1066 }
 0x3f0   : > { %1064 = vst.msk [vmem:[#allocation3] sm:$0xff] %vm1063_vm6, %v1061_v1 }
 0x3f3   : > { %v1069_v2 = vpop.permute.xlu0 %1068  ;;  %v1106_v0 = vpop.permute.xlu1 %1105 }
 0x3f4   : > { %v1071_v3 = vsel %vm1070_vm7, %v1067_v46, %v1069_v2  ;;  %v1128_v14 = vmul.f32 %v2499_v61, %v1106_v0 }
 0x3f5   : > { %1074 = vst.msk [vmem:[#allocation3] sm:$0xff] %vm1073_vm8, %v1071_v3 }
 0x3f7   : > { %v1111_v6 = vpop.permute.xlu0 %1110  ;;  %v1115_v9 = vpop.permute.xlu1 %1114 }
 0x3f8   : > { %v1129_v17 = vmul.f32 %v2499_v61, %v1111_v6  ;;  %v1130_v51 = vmul.f32 %v2499_v61, %v1115_v9 }
 0x3fb   : > { %v1119_v10 = vpop.permute.xlu0 %1118  ;;  %v1188_v19 = vpop.permute.xlu1 %1187 }
 0x3fc   : > { %v1102_v4 = vld [vmem:[#allocation3] sm:$0xff]  ;;  %v1131_v5 = vmul.f32 %v2499_v61, %v1119_v10  ;;  %v1689_v21 = vpack.i.bf16 %v1188_v19, %v2499_v61 }
 0x3fd   : > { %1134 = vrot.lane.b32.xlu0 %v1102_v4, %s1884_s9  ;;  %v1108_v7 = vmul.f32 %v1106_v0, %v1102_v4  ;;  %v1113_v8 = vmul.f32 %v1111_v6, %v1102_v4  ;;  %v1117_v18 = vmul.f32 %v1115_v9, %v1102_v4  ;;  %v1121_v24 = vmul.f32 %v1119_v10, %v1102_v4 }
 0x3fe   : > { %v1125_v12 = vmul.f32 %v1123_v60, %v1102_v4  ;;  %v1103_v29 = vmul.f32 %v2497_v20, %v1102_v4  ;;  %v1197_v20 = vld [vmem:[%s2610_s5 + $0x10] sm:$0xff] }
 0x3ff   : > { %1138 = vrot.lane.b32.xlu1 %v1108_v7, %s1874_s0 }
 0x401   : > { %1142 = vrot.lane.b32.xlu0 %v1113_v8, %s1905_s10 }
 0x403   : > { %1145 = vrot.lane.b32.xlu1 %v1102_v4, %s1886_s22 }
 0x405   : > { %1149 = vrot.lane.b32.xlu0 %v1117_v18, %s1906_s20 }
 0x407   : > { %1153 = vrot.lane.b32.xlu1 %v1121_v24, %s1907_s17 }
 0x409   : > { %1156 = vrot.lane.b32.xlu0 %v1102_v4, %s1908_s16 }
 0x40b   : > { %1160 = vrot.lane.b32.xlu1 %v1125_v12, %s1888_s15 }
 0x40d   : > { %1164 = vrot.lane.b32.xlu0 %v2499_v61, %s1884_s9 }
 0x40f   : > { %1168 = vrot.lane.b32.xlu1 %v1128_v14, %s1874_s0  ;;  %s1300_s0 = scalar_lea.sflag [#allocation7], %s2128_s13 }
 0x411   : > { %1172 = vrot.lane.b32.xlu0 %v1129_v17, %s1905_s10  ;;  %s1455_s10 = sshll.u32 %s1972_s28, 8  ;;  %s1909_s28 = smov [#allocation11]  }
 0x412   : > { %s2558_s21 = scalar_lea.hbm %s2612_s7, %s1455_s10  ;;  %s1790_s15 = sshll.u32 %s1909_s28, 4  ;;  %s1791_s15 = int_to_ptr.vmem [resolvable:$false] %s1790_s15 }
 0x413   : > { %1175 = vrot.lane.b32.xlu1 %v2499_v61, %s1886_s22  ;;  %s1792_s2 = scalar_lea.vmem %s1791_s15, 512 }
 0x415   : > { %1179 = vrot.lane.b32.xlu0 %v1130_v51, %s1906_s20  ;;  %s347_s20 = scalar_lea.vmem [#allocation11], %s1431_s11 }
 0x417   : > { %1183 = vrot.lane.b32.xlu1 %v1131_v5, %s1907_s17  ;;  %s1313_s17 = sshll.u32 %s347_s20, 4  ;;  %s2560_s17 = int_to_ptr.vmem [resolvable:$true] %s1313_s17 }
 0x418   : > { %s1786_s9 = scalar_lea.vmem %s2560_s17, 256  ;;  %p1793_p9 = scmp.lt.s32.totalorder %s2560_s17, %s1791_s15 }
 0x419   : > { %1690 = vrot.lane.b32.xlu0 %v1689_v21, %s1908_s16  ;;  %p1787_p10 = scmp.ne.s32.totalorder %s2560_s17, %s1786_s9  ;;  %p1794_p1 = scmp.lt.s32.totalorder %s1792_s2, %s1786_s9 }
 0x41b   : > { %1203 = vperm.xlu1 %1688, %v1199_v22   ;;  %p1788_p3 = pnand %p1787_p10, %p2643_p13  ;;  %p1795_p5 = por %p1794_p1, %p1793_p9 }
 0x41d   : > { %1208 = vperm.xlu0 %1694, %v1200_v28   ;;  %p1789_p7 = pneg %p1788_p3 }
 0x41f   : > { %p1796_p2 = pnand %p1795_p5, %p1789_p7 }
 0x46f   : > { %v1135_v32 = vpop.permute.xlu0 %1134 }
 0x470   : > { %v1520_v30 = vpack.c.bf16 %v1135_v32, %v1103_v29 }
 0x471   : > { %v1139_v35 = vpop.permute.xlu1 %1138 }
 0x472   : > { %1521 = vmatpush1.bf16.msra.mxu1 %v1520_v30 }
 0x473   : > { %v1143_v36 = vpop.permute.xlu0 %1142  ;;  %1522 = vmatprep.subr.bf16.mxu1 %v1891_v34 }
 0x474   : > { %v1523_v37 = vpack.c.bf16 %v1143_v36, %v1139_v35 }
 0x475   : > { %v1146_v39 = vpop.permute.xlu1 %1145 }
 0x476   : > { %1524 = vmatpush1.bf16.msra.mxu1 %v1523_v37 }
 0x477   : > { %v1150_v44 = vpop.permute.xlu0 %1149  ;;  %1525 = vmatprep.subr.bf16.mxu1 %v1891_v34 }
 0x478   : > { %v1526_v48 = vpack.c.bf16 %v1150_v44, %v1146_v39 }
 0x479   : > { %v1154_v47 = vpop.permute.xlu1 %1153 }
 0x47a   : > { %1527 = vmatpush1.bf16.msra.mxu1 %v1526_v48 }
 0x47b   : > { %v1157_v49 = vpop.permute.xlu0 %1156  ;;  %1528 = vmatprep.subr.bf16.mxu1 %v1891_v34 }
 0x47c   : > { %v1529_v50 = vpack.c.bf16 %v1157_v49, %v1154_v47 }
 0x47d   : > { %v1161_v52 = vpop.permute.xlu1 %1160 }
 0x47e   : > { %1530 = vmatpush1.bf16.msra.mxu1 %v1529_v50  ;;  %v1532_v15 = vpack.c.bf16 %v1127_v45, %v1161_v52 }
 0x47f   : > { %v1165_v53 = vpop.permute.xlu0 %1164  ;;  %1531 = vmatprep.subr.bf16.mxu1 %v1891_v34 }
 0x481   : > { %v1169_v54 = vpop.permute.xlu1 %1168 }
 0x482   : > { %1533 = vmatpush1.bf16.msra.mxu1 %v1532_v15  ;;  %v1535_v11 = vpack.c.bf16 %v1169_v54, %v1165_v53 }
 0x483   : > { %v1173_v55 = vpop.permute.xlu0 %1172  ;;  %1534 = vmatprep.subr.bf16.mxu1 %v1891_v34 }
 0x485   : > { %v1176_v56 = vpop.permute.xlu1 %1175 }
 0x486   : > { %1536 = vmatpush1.bf16.msra.mxu1 %v1535_v11  ;;  %v1538_v41 = vpack.c.bf16 %v1176_v56, %v1173_v55 }
 0x487   : > { %v1180_v16 = vpop.permute.xlu0 %1179  ;;  %1537 = vmatprep.subr.bf16.mxu1 %v1891_v34 }
 0x489   : > { %v1184_v27 = vpop.permute.xlu1 %1183 }
 0x48a   : > { %1539 = vmatpush1.bf16.msra.mxu1 %v1538_v41  ;;  %v1541_v33 = vpack.c.bf16 %v1184_v27, %v1180_v16 }
 0x48b   : > { %v1691_v31 = vpop.permute.xlu0 %1690  ;;  %1540 = vmatprep.subr.bf16.mxu1 %v1891_v34 }
 0x48c   : > { %v1693_v26 = vunpack.i.h.bf16 %v1691_v31  ;;  %v1692_v57 = vunpack.i.l.bf16 %v1691_v31 }
 0x48e   : > { %1542 = vmatpush1.bf16.msra.mxu1 %v1541_v33  ;;  %v1544_v23 = vpack.c.bf16 %v1693_v26, %v1692_v57 }
 0x48f   : > { %1543 = vmatprep.subr.bf16.mxu1 %v1891_v34 }
 0x492   : > { %1545 = vmatpush1.bf16.msra.mxu1 %v1544_v23 }
 0x495   : > { %1282 = vmatmul.mubr.f32.vlgmr.msra.gmra.mrb[0].mxu1 %v1195_v58 }
 0x496   : > { %1448 = vmatprep.mubr.msk.f32.mxu1 %vm364_vm0, %v1198_v13 }
 0x499   : > { %1287 = vmatmul.mubr.f32.gmra.mrb[2].mxu1 %v1197_v20 }
 0x49a   : > { %v1204_v34 = vpop.permute.xlu1 %1203 }
 0x49c   : > { %v1209_v25 = vpop.permute.xlu0 %1208 }
 0x568   : > { %v1283_v60 = vpop.f32.mrb[0].mxu1 }
 0x569   : > { %v1284_v61 = vadd.f32 %v1283_v60, %v1204_v34  ;;  %v1285_v40 = vpop.f32.mrb[1].mxu1 }
 0x56b   : > { %v1292_v42 = vmul.f32 0.01, %v1284_v61 }
 0x56c   : > { %v1288_v43 = vpop.f32.mrb[2].mxu1 }
 0x56d   : > { %v1294_v62 = vmax.f32 %v1284_v61, %v1292_v42  ;;  %v1289_v63 = vadd.f32 %v1288_v43, %v1209_v25  ;;  %v1290_v59 = vpop.f32.mrb[3].mxu1 }
 0x56f   : > { %1297 = vst.msk [vmem:[%s347_s20] sm:$0xff] %vm1296_vm9, %v1294_v62  ;;  %v1293_v1 = vmul.f32 0.01, %v1289_v63 }
 0x571   : > { %v1295_v46 = vmax.f32 %v1289_v63, %v1293_v1 }
 0x573   : > { %1298 = vst.msk [vmem:[%s347_s20 + $0x8] sm:$0xff] %vm1296_vm9, %v1295_v46 }
 0x574   : > { %1799 = shalt.err (!%p1796_p2)
}
 0x575   : > { %s1800_s22 = scalar_lea.hbm %s2558_s21, 256  ;;  %s1804_s29 = scalar_lea.hbm %s2612_s7, 512 }
 0x576   : > { %p1801_p6 = scmp.ne.s32.totalorder %s2558_s21, %s1800_s22  ;;  %p1805_p12 = scmp.lt.u32.totalorder %s2558_s21, %s2612_s7 }
 0x577   : > { %p1806_p11 = scmp.lt.u32.totalorder %s1804_s29, %s1800_s22  ;;  %p1808_p10 = scmp.lt.u32.totalorder %s1800_s22, %s2558_s21 }
 0x578   : > { %p1802_p8 = pnand %p1801_p6, %p2643_p13 }
 0x579   : > { %p1807_p0 = por %p1806_p11, %p1805_p12 }
 0x57a   : > { %p1803_p4 = pneg %p1802_p8 }
 0x57b   : > { %p1809_p3 = por %p1808_p10, %p1807_p0 }
 0x57d   : > { %p1810_p7 = pnand %p1809_p3, %p1803_p4 }
 0x57f   : > { %1813 = shalt.err (!%p1810_p7)
}
 0x580   : > { %s1910_s11 = smov 128  }
 0x581   : > { %1554 = dma.vmem_to_hbm [thread:$0]  (%p2643_p13), %s2560_s17, 256, %s2558_s21, %s1300_s0, %s1910_s11, %s1910_s11, %s1904_s14  }
 0x582 PF: > { %s1328_s10 = sand.u32 1, %s1848_s24   ;;  %p2644_p9 = scmp.ne.s32.totalorder %s2626_s8, 0 }
 0x583   : > { %p2645_p1 = scmp.ge.s32.totalorder %s1860_s27, 2  ;;  %s1329_s20 = scalar_lea.sflag [#allocation7], %s1328_s10 }
 0x585   : > { %p1568_p5 = pnand %p2645_p1, %p2644_p9 }
 0x587   : > { %1843 = dma.done.wait (!%p1568_p5), %s1329_s20, 256  }
 0x588   : > { %1845 = vsyncadd (!%p1568_p5), %s1329_s20, 4294967040  ;;  %s2646_s27 = sld [smem:[#allocation17_spill]]  ;;  %s2647_s19 = sld [smem:[#allocation16_spill]] }
 0x589   : > { %s2648_s26 = sld [smem:[#allocation18_spill]]  ;;  %s2649_s24 = smov %s1852_s25 }
 0x58e   : > { %p23_p2 = scmp.ge.s32.totalorder %s2646_s27, 4   ;;  %s2650_s25 = smov %s2647_s19 }
 0x590   :  { %25 = sbr.rel (!%p23_p2) target bundleno = 10 (0xa), region = 110 }
 0x597   :  { %1334 = vsyncpa [#allocation6], 1 }
 0x598   :  { %1336 = vsyncpa [#allocation6 + $0x1], 1 }
 0x599   :  { %1337 = vsyncpa [#allocation9], 1 }
 0x59a   :  { %1339 = vsyncpa [#allocation9 + $0x1], 1 }
 0x59b   :  { %1340 = vsyncpa [#allocation7], 1 }
 0x59c   :  { %1342 = vsyncpa [#allocation7 + $0x1], 1 }

</bundles_post_ra>
